<compile_context>
chip_gen: v6e
topology: v6e:2x2x1
jax: 0.10.0
libtpu: 0.0.40
codegen_flags: <defaults>
</compile_context>

<pallas_src>
import jax
import jax.numpy as jnp
from jax.experimental import pallas as pl
from jax.experimental.pallas import tpu as pltpu


def _equi_output_kernel(x_ref, v_ref, w1_ref, w2_ref,
                        wu1x_ref, wu1v_ref, bu1_ref, wu2g_ref, bu2g_ref,
                        out_ref):
    x = x_ref[...]                                   # (TN, H), native dtype
    v = v_ref[...]                                   # (3, TN, H), native dtype
    K, TN, H = v.shape

    # vec1 = ||vec1_proj(v)||_2 over the K=3 axis -> (TN, H)
    # Leading-dim merge (3, TN, H) -> (3*TN, H) is a contiguous, zero-copy view.
    vp = jnp.dot(v.reshape(K * TN, H), w1_ref[...],
                 preferred_element_type=jnp.float32).reshape(K, TN, H)
    # K is a leading dim, so the reduction is three dense VPU mul-adds.
    vec1 = jnp.sqrt(vp[0] * vp[0] + vp[1] * vp[1] + vp[2] * vp[2])   # (TN, H) f32

    # update_net( cat(x, vec1) ) : Linear(2H->H) -> SiLU -> gate column of Linear(H->2)
    # concat avoided by splitting the first weight into its x / vec1 halves.
    h = (jnp.dot(x, wu1x_ref[...], preferred_element_type=jnp.float32)
         + jnp.dot(vec1.astype(wu1v_ref.dtype), wu1v_ref[...],
                   preferred_element_type=jnp.float32)
         + bu1_ref[...])                             # (TN, H) f32
    h = h * jax.nn.sigmoid(h)                        # SiLU (EUP)
    gate = (jnp.dot(h.astype(wu2g_ref.dtype), wu2g_ref[...],
                    preferred_element_type=jnp.float32)
            + bu2g_ref[...])                         # (TN, 1)  -- gate only

    # out[k, n] = gate[n] * sum_h v[k, n, h] * w2[h]
    # Fold the gate into the lane reduce so the (3, TN) output is produced directly
    # (lane-dense, full-width stores) without any transpose/relayout of gate.
    scaled_w = (gate * w2_ref[...]).astype(v.dtype)              # (TN, H)
    out_ref[...] = jnp.sum(v * scaled_w[None, :, :],
                           axis=-1).astype(out_ref.dtype)        # (3, TN)


def equi_output(x, vec, params, *, tile_n=128):
    """x: (N, H), vec: (N, 3, H) -> (N, 3).

    tile_n should be >= 128 (amortizes grid-step overhead, fills the MXU M dim,
    and makes the (3, tile_n) output block a full 128-lane store). For very large
    H on v7x (64 MiB VMEM), cap tile_n at ~512.
    """
    w1, w2, wu1, bu1, wu2, bu2 = params
    N, H = x.shape
    assert vec.shape == (N, 3, H)

    # vec -> (3, N, H): keeps the K=3 axis off the sublane dim (no 8/3 padding),
    # cuts vec DMA/vreg footprint ~2.7x and makes the in-kernel reshape zero-copy.
    vec_t = jnp.transpose(vec, (1, 0, 2))            # (3, N, H)

    # Pad N up to a multiple of tile_n so large tiles work for any node count.
    n_pad = (-N) % tile_n
    if n_pad:
        x = jnp.pad(x, ((0, n_pad), (0, 0)))
        vec_t = jnp.pad(vec_t, ((0, 0), (0, n_pad), (0, 0)))
    Np = N + n_pad

    # Weight prep (all done once, outside the kernel).
    # TODO(synk): when 2H is a multiple of 256 on v6e/v7x, fuse wu1x/wu1v back into
    # a single (TN, 2H) x (2H, H) dot (one in-VMEM concat) for better MXU fill.
    wu1x = wu1[:H, :]                                # (H, H)  x-half of update_net[0]
    wu1v = wu1[H:, :]                                # (H, H)  vec1-half
    bu1_2d = bu1.reshape(1, H)
    wu2g = wu2[:, 1:2]                               # (H, 1)  gate column only
    bu2g = bu2[1:2].reshape(1, 1)

    grid = (Np // tile_n,)
    bcast = lambda shape: pl.BlockSpec(shape, lambda i: tuple(0 for _ in shape))

    cost = pl.CostEstimate(
        flops=2 * Np * H * (3 * H + 2 * H + 1) + 4 * Np * 3 * H,
        transcendentals=Np * H,
        bytes_accessed=(Np * H + 3 * Np * H + 3 * Np
                        + 3 * H * H + 2 * H + 2) * 4,
    )

    out_t = pl.pallas_call(
        _equi_output_kernel,
        out_shape=jax.ShapeDtypeStruct((3, Np), x.dtype),
        grid_spec=pltpu.PrefetchScalarGridSpec(
            num_scalar_prefetch=0,
            grid=grid,
            in_specs=[
                pl.BlockSpec((tile_n, H), lambda i: (i, 0)),        # x
                pl.BlockSpec((3, tile_n, H), lambda i: (0, i, 0)),  # vec (3, N, H)
                bcast((H, H)),                                      # w1 (vec1_proj)
                bcast((1, H)),                                      # w2 (vec2_proj)
                bcast((H, H)),                                      # update_net[0] W, x half
                bcast((H, H)),                                      # update_net[0] W, vec1 half
                bcast((1, H)),                                      # update_net[0] b
                bcast((H, 1)),                                      # update_net[2] W, gate col
                bcast((1, 1)),                                      # update_net[2] b, gate
            ],
            out_specs=pl.BlockSpec((3, tile_n), lambda i: (0, i)),  # lane-dense (3, N)
        ),
        compiler_params=pltpu.CompilerParams(
            dimension_semantics=("parallel",)),
        cost_estimate=cost,
    )(x, vec_t, w1, w2, wu1x, wu1v, bu1_2d, wu2g, bu2g)

    return jnp.transpose(out_t[:, :N], (1, 0))       # (N, 3)


def _xavier_uniform(key, fan_in, fan_out, shape):
    bound = (6.0 / (fan_in + fan_out)) ** 0.5
    return jax.random.uniform(key, shape, jnp.float32, -bound, bound)


def init_params(key, hidden_channels):
    H = hidden_channels
    k1, k2, k3, k4 = jax.random.split(key, 4)
    # stored in (in, out) layout (i.e. already transposed vs. torch's (out, in)),
    # except vec2_proj which is kept in torch's (out=1, in=H) layout.
    w1 = _xavier_uniform(k1, H, H, (H, H))           # vec1_proj.weight.T
    w2 = _xavier_uniform(k2, H, 1, (1, H))           # vec2_proj.weight (1, H)
    wu1 = _xavier_uniform(k3, 2 * H, H, (2 * H, H))  # update_net[0].weight.T
    bu1 = jnp.zeros((H,), jnp.float32)               # update_net[0].bias (zeros)
    wu2 = _xavier_uniform(k4, H, 2, (H, 2))          # update_net[2].weight.T
    bu2 = jnp.zeros((2,), jnp.float32)               # update_net[2].bias (zeros)
    return (w1, w2, wu1, bu1, wu2, bu2)


def equi_output_reference(x, vec, params):
    """Pure-JAX reference matching the PyTorch forward."""
    w1, w2, wu1, bu1, wu2, bu2 = params
    vp = jnp.einsum('nkh,ho->nko', vec, w1)
    vec1 = jnp.linalg.norm(vp, axis=-2)                         # (N, H)
    vec2 = jnp.einsum('nkh,oh->nko', vec, w2)                   # (N, 3, 1)
    h = jnp.concatenate([x, vec1], axis=-1) @ wu1 + bu1
    h = jax.nn.silu(h)
    o = h @ wu2 + bu2
    v_gate = o[:, 1:]                                           # (N, 1)
    v_out = v_gate[:, None, :] * vec2                           # (N, 3, 1)
    return jnp.squeeze(v_out)                                   # (N, 3)


if __name__ == "__main__":
    key = jax.random.PRNGKey(0)
    N, H = 16, 32
    kx, kv, kp = jax.random.split(key, 3)
    x = jax.random.normal(kx, (N, H), jnp.float32)
    vec = jax.random.normal(kv, (N, 3, H), jnp.float32)
    params = init_params(kp, H)

    out = equi_output(x, vec, params, tile_n=128)
    out = jax.block_until_ready(out)

    ref = equi_output_reference(x, vec, params)
    assert out.shape == (N, 3)
    assert jnp.allclose(out, ref, atol=1e-4, rtol=1e-4), "mismatch vs reference"
    print("KERNEL_OK")
</pallas_src>

<mosaic_0001>
module attributes {stable_mosaic.version = 11 : i64} {
  func.func @_equi_output_kernel(%arg0: i32, %arg1: memref<128x32xf32, #tpu.memory_space<vmem>>, %arg2: memref<3x128x32xf32, #tpu.memory_space<vmem>>, %arg3: memref<32x32xf32, #tpu.memory_space<vmem>>, %arg4: memref<1x32xf32, #tpu.memory_space<vmem>>, %arg5: memref<32x32xf32, #tpu.memory_space<vmem>>, %arg6: memref<32x32xf32, #tpu.memory_space<vmem>>, %arg7: memref<1x32xf32, #tpu.memory_space<vmem>>, %arg8: memref<32x1xf32, #tpu.memory_space<vmem>>, %arg9: memref<1x1xf32, #tpu.memory_space<vmem>>, %arg10: memref<3x128xf32, #tpu.memory_space<vmem>>) attributes {dimension_semantics = [#tpu.dimension_semantics<parallel>], iteration_bounds = array<i64: 1>, scalar_prefetch = 0 : i64, scratch_operands = 0 : i64, tpu.core_type = #tpu.core_type<tc>, window_params = [{transform_indices = @transform_0, window_bounds = array<i64: 128, 32>}, {transform_indices = @transform_1, window_bounds = array<i64: 3, 128, 32>}, {pipeline_mode = #tpu.pipeline_mode<synchronous>, transform_indices = @transform_2, window_bounds = array<i64: 32, 32>}, {pipeline_mode = #tpu.pipeline_mode<synchronous>, transform_indices = @transform_3, window_bounds = array<i64: 1, 32>}, {pipeline_mode = #tpu.pipeline_mode<synchronous>, transform_indices = @transform_4, window_bounds = array<i64: 32, 32>}, {pipeline_mode = #tpu.pipeline_mode<synchronous>, transform_indices = @transform_5, window_bounds = array<i64: 32, 32>}, {pipeline_mode = #tpu.pipeline_mode<synchronous>, transform_indices = @transform_6, window_bounds = array<i64: 1, 32>}, {pipeline_mode = #tpu.pipeline_mode<synchronous>, transform_indices = @transform_7, window_bounds = array<i64: 32, 1>}, {pipeline_mode = #tpu.pipeline_mode<synchronous>, transform_indices = @transform_8, window_bounds = array<i64: 1, 1>}, {transform_indices = @transform_9, window_bounds = array<i64: 3, 128>}]} {
    %c0 = arith.constant 0 : index
    %c0_0 = arith.constant 0 : index
    %0 = vector.load %arg1[%c0, %c0_0] : memref<128x32xf32, #tpu.memory_space<vmem>>, vector<128x32xf32>
    %c0_1 = arith.constant 0 : index
    %c0_2 = arith.constant 0 : index
    %c0_3 = arith.constant 0 : index
    %1 = vector.load %arg2[%c0_1, %c0_2, %c0_3] : memref<3x128x32xf32, #tpu.memory_space<vmem>>, vector<3x128x32xf32>
    %2 = vector.shape_cast %1 : vector<3x128x32xf32> to vector<384x32xf32>
    %c0_4 = arith.constant 0 : index
    %c0_5 = arith.constant 0 : index
    %3 = vector.load %arg3[%c0_4, %c0_5] : memref<32x32xf32, #tpu.memory_space<vmem>>, vector<32x32xf32>
    %cst = arith.constant dense<0.000000e+00> : vector<384x32xf32>
    %4 = tpu.matmul %2, %3, %cst {dimension_numbers = #tpu.dot_dimension_numbers<[1], [0], [0], [1], [0, 0, 1, 1], [], []>} : vector<384x32xf32>, vector<32x32xf32>, vector<384x32xf32> -> vector<384x32xf32>
    %5 = vector.shape_cast %4 : vector<384x32xf32> to vector<3x128x32xf32>
    %6 = vector.extract_strided_slice %5 {offsets = [0, 0, 0], sizes = [1, 128, 32], strides = [1, 1, 1]} : vector<3x128x32xf32> to vector<1x128x32xf32>
    %7 = vector.shape_cast %6 : vector<1x128x32xf32> to vector<128x32xf32>
    %8 = vector.extract_strided_slice %5 {offsets = [0, 0, 0], sizes = [1, 128, 32], strides = [1, 1, 1]} : vector<3x128x32xf32> to vector<1x128x32xf32>
    %9 = vector.shape_cast %8 : vector<1x128x32xf32> to vector<128x32xf32>
    %10 = arith.mulf %7, %9 : vector<128x32xf32>
    %11 = vector.extract_strided_slice %5 {offsets = [1, 0, 0], sizes = [1, 128, 32], strides = [1, 1, 1]} : vector<3x128x32xf32> to vector<1x128x32xf32>
    %12 = vector.shape_cast %11 : vector<1x128x32xf32> to vector<128x32xf32>
    %13 = vector.extract_strided_slice %5 {offsets = [1, 0, 0], sizes = [1, 128, 32], strides = [1, 1, 1]} : vector<3x128x32xf32> to vector<1x128x32xf32>
    %14 = vector.shape_cast %13 : vector<1x128x32xf32> to vector<128x32xf32>
    %15 = arith.mulf %12, %14 : vector<128x32xf32>
    %16 = arith.addf %10, %15 : vector<128x32xf32>
    %17 = vector.extract_strided_slice %5 {offsets = [2, 0, 0], sizes = [1, 128, 32], strides = [1, 1, 1]} : vector<3x128x32xf32> to vector<1x128x32xf32>
    %18 = vector.shape_cast %17 : vector<1x128x32xf32> to vector<128x32xf32>
    %19 = vector.extract_strided_slice %5 {offsets = [2, 0, 0], sizes = [1, 128, 32], strides = [1, 1, 1]} : vector<3x128x32xf32> to vector<1x128x32xf32>
    %20 = vector.shape_cast %19 : vector<1x128x32xf32> to vector<128x32xf32>
    %21 = arith.mulf %18, %20 : vector<128x32xf32>
    %22 = arith.addf %16, %21 : vector<128x32xf32>
    %23 = math.sqrt %22 : vector<128x32xf32>
    %c0_6 = arith.constant 0 : index
    %c0_7 = arith.constant 0 : index
    %24 = vector.load %arg5[%c0_6, %c0_7] : memref<32x32xf32, #tpu.memory_space<vmem>>, vector<32x32xf32>
    %cst_8 = arith.constant dense<0.000000e+00> : vector<128x32xf32>
    %25 = tpu.matmul %0, %24, %cst_8 {dimension_numbers = #tpu.dot_dimension_numbers<[1], [0], [0], [1], [0, 0, 1, 1], [], []>} : vector<128x32xf32>, vector<32x32xf32>, vector<128x32xf32> -> vector<128x32xf32>
    %c0_9 = arith.constant 0 : index
    %c0_10 = arith.constant 0 : index
    %26 = vector.load %arg6[%c0_9, %c0_10] : memref<32x32xf32, #tpu.memory_space<vmem>>, vector<32x32xf32>
    %cst_11 = arith.constant dense<0.000000e+00> : vector<128x32xf32>
    %27 = tpu.matmul %23, %26, %cst_11 {dimension_numbers = #tpu.dot_dimension_numbers<[1], [0], [0], [1], [0, 0, 1, 1], [], []>} : vector<128x32xf32>, vector<32x32xf32>, vector<128x32xf32> -> vector<128x32xf32>
    %28 = arith.addf %25, %27 : vector<128x32xf32>
    %c0_12 = arith.constant 0 : index
    %c0_13 = arith.constant 0 : index
    %29 = vector.load %arg7[%c0_12, %c0_13] : memref<1x32xf32, #tpu.memory_space<vmem>>, vector<1x32xf32>
    %30 = vector.broadcast %29 : vector<1x32xf32> to vector<128x32xf32>
    %31 = arith.addf %28, %30 : vector<128x32xf32>
    %32 = arith.negf %31 : vector<128x32xf32>
    %33 = math.exp %32 : vector<128x32xf32>
    %cst_14 = arith.constant 1.000000e+00 : f32
    %34 = vector.broadcast %cst_14 : f32 to vector<128x32xf32>
    %35 = arith.addf %34, %33 : vector<128x32xf32>
    %36 = arith.divf %34, %35 : vector<128x32xf32>
    %37 = arith.mulf %31, %36 : vector<128x32xf32>
    %c0_15 = arith.constant 0 : index
    %c0_16 = arith.constant 0 : index
    %38 = vector.load %arg8[%c0_15, %c0_16] : memref<32x1xf32, #tpu.memory_space<vmem>>, vector<32x1xf32>
    %cst_17 = arith.constant dense<0.000000e+00> : vector<128x1xf32>
    %39 = tpu.matmul %37, %38, %cst_17 {dimension_numbers = #tpu.dot_dimension_numbers<[1], [0], [0], [1], [0, 0, 1, 1], [], []>} : vector<128x32xf32>, vector<32x1xf32>, vector<128x1xf32> -> vector<128x1xf32>
    %c0_18 = arith.constant 0 : index
    %c0_19 = arith.constant 0 : index
    %40 = vector.load %arg9[%c0_18, %c0_19] : memref<1x1xf32, #tpu.memory_space<vmem>>, vector<1x1xf32>
    %41 = vector.broadcast %40 : vector<1x1xf32> to vector<128x1xf32>
    %42 = arith.addf %39, %41 : vector<128x1xf32>
    %c0_20 = arith.constant 0 : index
    %c0_21 = arith.constant 0 : index
    %43 = vector.load %arg4[%c0_20, %c0_21] : memref<1x32xf32, #tpu.memory_space<vmem>>, vector<1x32xf32>
    %44 = vector.broadcast %42 : vector<128x1xf32> to vector<128x32xf32>
    %45 = vector.broadcast %43 : vector<1x32xf32> to vector<128x32xf32>
    %46 = arith.mulf %44, %45 : vector<128x32xf32>
    %47 = vector.shape_cast %46 : vector<128x32xf32> to vector<1x128x32xf32>
    %48 = vector.broadcast %47 : vector<1x128x32xf32> to vector<3x128x32xf32>
    %49 = arith.mulf %1, %48 : vector<3x128x32xf32>
    %cst_22 = arith.constant dense<0.000000e+00> : vector<3x128xf32>
    %50 = vector.multi_reduction <add>, %49, %cst_22 [2] : vector<3x128x32xf32> to vector<3x128xf32>
    %c0_23 = arith.constant 0 : index
    %c0_24 = arith.constant 0 : index
    %51 = vector.load %arg10[%c0_23, %c0_24] : memref<3x128xf32, #tpu.memory_space<vmem>>, vector<3x128xf32>
    tpu.vector_store %arg10[%c0_23, %c0_24], %50 {strides = array<i32>} : memref<3x128xf32, #tpu.memory_space<vmem>>, vector<3x128xf32>,
    return
  }
  func.func @transform_0(%arg0: i32) -> (i32, i32) {
    %c0_i32 = arith.constant 0 : i32
    %c0_i32_0 = arith.constant 0 : i32
    return %arg0, %c0_i32 : i32, i32
  }
  func.func @transform_1(%arg0: i32) -> (i32, i32, i32) {
    %c0_i32 = arith.constant 0 : i32
    %c0_i32_0 = arith.constant 0 : i32
    %c0_i32_1 = arith.constant 0 : i32
    return %c0_i32, %arg0, %c0_i32_0 : i32, i32, i32
  }
  func.func @transform_2(%arg0: i32) -> (i32, i32) {
    %c0_i32 = arith.constant 0 : i32
    %c0_i32_0 = arith.constant 0 : i32
    %c0_i32_1 = arith.constant 0 : i32
    return %c0_i32, %c0_i32_0 : i32, i32
  }
  func.func @transform_3(%arg0: i32) -> (i32, i32) {
    %c0_i32 = arith.constant 0 : i32
    %c0_i32_0 = arith.constant 0 : i32
    %c0_i32_1 = arith.constant 0 : i32
    return %c0_i32, %c0_i32_0 : i32, i32
  }
  func.func @transform_4(%arg0: i32) -> (i32, i32) {
    %c0_i32 = arith.constant 0 : i32
    %c0_i32_0 = arith.constant 0 : i32
    %c0_i32_1 = arith.constant 0 : i32
    return %c0_i32, %c0_i32_0 : i32, i32
  }
  func.func @transform_5(%arg0: i32) -> (i32, i32) {
    %c0_i32 = arith.constant 0 : i32
    %c0_i32_0 = arith.constant 0 : i32
    %c0_i32_1 = arith.constant 0 : i32
    return %c0_i32, %c0_i32_0 : i32, i32
  }
  func.func @transform_6(%arg0: i32) -> (i32, i32) {
    %c0_i32 = arith.constant 0 : i32
    %c0_i32_0 = arith.constant 0 : i32
    %c0_i32_1 = arith.constant 0 : i32
    return %c0_i32, %c0_i32_0 : i32, i32
  }
  func.func @transform_7(%arg0: i32) -> (i32, i32) {
    %c0_i32 = arith.constant 0 : i32
    %c0_i32_0 = arith.constant 0 : i32
    %c0_i32_1 = arith.constant 0 : i32
    return %c0_i32, %c0_i32_0 : i32, i32
  }
  func.func @transform_8(%arg0: i32) -> (i32, i32) {
    %c0_i32 = arith.constant 0 : i32
    %c0_i32_0 = arith.constant 0 : i32
    %c0_i32_1 = arith.constant 0 : i32
    return %c0_i32, %c0_i32_0 : i32, i32
  }
  func.func @transform_9(%arg0: i32) -> (i32, i32) {
    %c0_i32 = arith.constant 0 : i32
    %c0_i32_0 = arith.constant 0 : i32
    return %c0_i32, %arg0 : i32, i32
  }
}

</mosaic_0001>

<bundles_post_ra>
// kernel: tpu_custom_call.1
= control target key start
LH: loop header
LB: loop body
LE: loop exit
PB: predicated region body
PF: predicated region fallthrough
CT: control target
= control target key end

     0   :  { %s3764_s0 = inlined_call_operand.vmem [shape: f32[128,32], index: 0, kind: input, shape index: {}]   ;;  %s3765_s1 = inlined_call_operand.vmem [shape: f32[3,128,32], index: 1, kind: input, shape index: {}]   ;;  %s3766_s2 = inlined_call_operand.vmem [shape: f32[32,32], index: 2, kind: input, shape index: {}]   ;;  %s3767_s3 = inlined_call_operand.vmem [shape: f32[1,32], index: 3, kind: input, shape index: {}]   ;;  %s3768_s4 = inlined_call_operand.vmem [shape: f32[32,32], index: 4, kind: input, shape index: {}]   ;;  %s3769_s5 = inlined_call_operand.vmem [shape: f32[32,32], index: 5, kind: input, shape index: {}]   ;;  %s3770_s6 = inlined_call_operand.vmem [shape: f32[1,32], index: 6, kind: input, shape index: {}]   ;;  %s3771_s7 = inlined_call_operand.vmem [shape: f32[32,1], index: 7, kind: input, shape index: {}]   ;;  %s3772_s8 = inlined_call_operand.<no memory space> [shape: f32[1,1], index: 8, kind: input, shape index: {}]   ;;  %s3773_s9 = inlined_call_operand.hbm [shape: f32[3,128], index: 9, kind: output, shape index: {}]  }
   0x1   :  { %v14_v0 = vstv %s3772_s8 }
   0x2   :  { %15 = vst [vmem:[#allocation2] sm:$0x1] %v14_v0 }
   0x3   :  { %v102_v1 = vld [vmem:[%s3766_s2 + $0x18] sm:$0xff]  ;;  %v101_v2 = vld [vmem:[%s3766_s2 + $0x10] sm:$0xff]  ;;  %vm103_vm0 = vcmask 261120   ;;  %v51_v3 = vld [vmem:[%s3765_s1] sm:$0xff] }
   0x4   :  { %2337 = vmatprep.subr.mxu0 %v102_v1  ;;  %v100_v4 = vld [vmem:[%s3766_s2 + $0x8] sm:$0xff]  ;;  %2345 = vmatprep.mubr.msk.f32.mxu0 %vm103_vm0, %v51_v3  ;;  %v99_v5 = vld [vmem:[%s3766_s2] sm:$0xff]  ;;  %v53_v7 = vld [vmem:[%s3765_s1 + $0x10] sm:$0xff] }
   0x5   :  { %2338 = vmatpush3.msra.mxu0 %v102_v1  ;;  %v52_v6 = vld [vmem:[%s3765_s1 + $0x8] sm:$0xff]  ;;  %v54_v8 = vld [vmem:[%s3765_s1 + $0x18] sm:$0xff]  ;;  %v55_v9 = vld [vmem:[%s3765_s1 + $0x20] sm:$0xff] }
   0x6   :  { %2339 = vmatprep.subr.mxu0 %v101_v2  ;;  %v56_v10 = vld [vmem:[%s3765_s1 + $0x28] sm:$0xff]  ;;  %v57_v11 = vld [vmem:[%s3765_s1 + $0x30] sm:$0xff] }
   0x7   :  { %2340 = vmatpush3.msra.mxu0 %v101_v2 }
   0x8   :  { %2341 = vmatprep.subr.mxu0 %v100_v4 }
   0x9   :  { %2342 = vmatpush3.msra.mxu0 %v100_v4 }
   0xa   :  { %2343 = vmatprep.subr.mxu0 %v99_v5 }
   0xb   :  { %2344 = vmatpush3.msra.mxu0 %v99_v5 }
   0xc   :  { %2346 = vmatmul.mubr.msk.f32.vlgmr.msra.gmra.mxu0 %vm103_vm0, %v52_v6 }
   0xd   :  { %2348 = vmatprep.mubr.msk.f32.mxu0 %vm103_vm0, %v53_v7 }
  0x10   :  { %2349 = vmatmul.mubr.msk.f32.gmra.mxu0 %vm103_vm0, %v54_v8 }
  0x11   :  { %2351 = vmatprep.mubr.msk.f32.mxu0 %vm103_vm0, %v55_v9 }
  0x14   :  { %2352 = vmatmul.mubr.msk.f32.gmra.mxu0 %vm103_vm0, %v56_v10 }
  0x15   :  { %16 = vsyncpa [#allocation4], 0  ;;  %2354 = vmatprep.mubr.msk.f32.mxu0 %vm103_vm0, %v57_v11  ;;  %v58_v12 = vld [vmem:[%s3765_s1 + $0x38] sm:$0xff]  ;;  %v59_v13 = vld [vmem:[%s3765_s1 + $0x40] sm:$0xff] }
  0x16   :  { %v60_v14 = vld [vmem:[%s3765_s1 + $0x48] sm:$0xff]  ;;  %v61_v15 = vld [vmem:[%s3765_s1 + $0x50] sm:$0xff]  ;;  %v62_v16 = vld [vmem:[%s3765_s1 + $0x58] sm:$0xff] }
  0x17   :  { %v63_v17 = vld [vmem:[%s3765_s1 + $0x60] sm:$0xff]  ;;  %v64_v18 = vld [vmem:[%s3765_s1 + $0x68] sm:$0xff]  ;;  %v65_v19 = vld [vmem:[%s3765_s1 + $0x70] sm:$0xff] }
  0x18   :  { %2355 = vmatmul.mubr.msk.f32.gmra.mxu0 %vm103_vm0, %v58_v12  ;;  %v66_v20 = vld [vmem:[%s3765_s1 + $0x78] sm:$0xff]  ;;  %v67_v21 = vld [vmem:[%s3765_s1 + $0x80] sm:$0xff]  ;;  %v68_v22 = vld [vmem:[%s3765_s1 + $0x88] sm:$0xff] }
  0x19   :  { %2357 = vmatprep.mubr.msk.f32.mxu0 %vm103_vm0, %v59_v13  ;;  %v69_v23 = vld [vmem:[%s3765_s1 + $0x90] sm:$0xff]  ;;  %v70_v24 = vld [vmem:[%s3765_s1 + $0x98] sm:$0xff]  ;;  %v71_v25 = vld [vmem:[%s3765_s1 + $0xa0] sm:$0xff] }
  0x1a   :  { %v72_v26 = vld [vmem:[%s3765_s1 + $0xa8] sm:$0xff]  ;;  %v73_v27 = vld [vmem:[%s3765_s1 + $0xb0] sm:$0xff]  ;;  %v74_v28 = vld [vmem:[%s3765_s1 + $0xb8] sm:$0xff] }
  0x1b   :  { %v75_v29 = vld [vmem:[%s3765_s1 + $0xc0] sm:$0xff]  ;;  %v76_v30 = vld [vmem:[%s3765_s1 + $0xc8] sm:$0xff]  ;;  %v77_v31 = vld [vmem:[%s3765_s1 + $0xd0] sm:$0xff] }
  0x1c   :  { %2358 = vmatmul.mubr.msk.f32.gmra.mxu0 %vm103_vm0, %v60_v14  ;;  %v78_v32 = vld [vmem:[%s3765_s1 + $0xd8] sm:$0xff]  ;;  %v79_v33 = vld [vmem:[%s3765_s1 + $0xe0] sm:$0xff]  ;;  %v80_v34 = vld [vmem:[%s3765_s1 + $0xe8] sm:$0xff] }
  0x1d   :  { %2360 = vmatprep.mubr.msk.f32.mxu0 %vm103_vm0, %v61_v15  ;;  %v81_v35 = vld [vmem:[%s3765_s1 + $0xf0] sm:$0xff]  ;;  %v82_v36 = vld [vmem:[%s3765_s1 + $0xf8] sm:$0xff]  ;;  %v83_v37 = vld [vmem:[%s3765_s1 + $0x100] sm:$0xff] }
  0x1e   :  { %v84_v38 = vld [vmem:[%s3765_s1 + $0x108] sm:$0xff]  ;;  %v85_v39 = vld [vmem:[%s3765_s1 + $0x110] sm:$0xff]  ;;  %v86_v40 = vld [vmem:[%s3765_s1 + $0x118] sm:$0xff] }
  0x1f   :  { %v87_v41 = vld [vmem:[%s3765_s1 + $0x120] sm:$0xff]  ;;  %v88_v42 = vld [vmem:[%s3765_s1 + $0x128] sm:$0xff]  ;;  %v89_v43 = vld [vmem:[%s3765_s1 + $0x130] sm:$0xff] }
  0x20   :  { %2361 = vmatmul.mubr.msk.f32.gmra.mxu0 %vm103_vm0, %v62_v16  ;;  %v90_v44 = vld [vmem:[%s3765_s1 + $0x138] sm:$0xff]  ;;  %v91_v45 = vld [vmem:[%s3765_s1 + $0x140] sm:$0xff]  ;;  %v92_v46 = vld [vmem:[%s3765_s1 + $0x148] sm:$0xff] }
  0x21   :  { %2363 = vmatprep.mubr.msk.f32.mxu0 %vm103_vm0, %v63_v17  ;;  %v93_v47 = vld [vmem:[%s3765_s1 + $0x150] sm:$0xff]  ;;  %v94_v48 = vld [vmem:[%s3765_s1 + $0x158] sm:$0xff]  ;;  %v95_v49 = vld [vmem:[%s3765_s1 + $0x160] sm:$0xff] }
  0x22   :  { %v96_v50 = vld [vmem:[%s3765_s1 + $0x168] sm:$0xff]  ;;  %v97_v51 = vld [vmem:[%s3765_s1 + $0x170] sm:$0xff]  ;;  %v98_v52 = vld [vmem:[%s3765_s1 + $0x178] sm:$0xff] }
  0x23   :  { %v752_v53 = vld [vmem:[%s3769_s5 + $0x18] sm:$0xff]  ;;  %v751_v54 = vld [vmem:[%s3769_s5 + $0x10] sm:$0xff]  ;;  %v750_v55 = vld [vmem:[%s3769_s5 + $0x8] sm:$0xff] }
  0x24   :  { %2364 = vmatmul.mubr.msk.f32.gmra.mxu0 %vm103_vm0, %v64_v18  ;;  %2417 = vmatprep.subr.mxu1 %v752_v53  ;;  %v749_v56 = vld [vmem:[%s3769_s5] sm:$0xff]  ;;  %v2957_v57 = vld [vmem:[%s3768_s4 + $0x18] sm:$0xff] }
  0x25   :  { %2366 = vmatprep.mubr.msk.f32.mxu0 %vm103_vm0, %v65_v19  ;;  %2418 = vmatpush3.msra.mxu1 %v752_v53 }
  0x26   :  { %2419 = vmatprep.subr.mxu1 %v751_v54 }
  0x27   :  { %2420 = vmatpush3.msra.mxu1 %v751_v54 }
  0x28   :  { %2367 = vmatmul.mubr.msk.f32.gmra.mxu0 %vm103_vm0, %v66_v20  ;;  %2421 = vmatprep.subr.mxu1 %v750_v55 }
  0x29   :  { %2369 = vmatprep.mubr.msk.f32.mxu0 %vm103_vm0, %v67_v21  ;;  %2422 = vmatpush3.msra.mxu1 %v750_v55 }
  0x2a   :  { %2423 = vmatprep.subr.mxu1 %v749_v56 }
  0x2b   :  { %2424 = vmatpush3.msra.mxu1 %v749_v56 }
  0x2c   :  { %2370 = vmatmul.mubr.msk.f32.gmra.mxu0 %vm103_vm0, %v68_v22  ;;  %2449 = vmatprep.subr.mxu1 %v2957_v57 }
  0x2d   :  { %2372 = vmatprep.mubr.msk.f32.mxu0 %vm103_vm0, %v69_v23 }
  0x30   :  { %2373 = vmatmul.mubr.msk.f32.gmra.mxu0 %vm103_vm0, %v70_v24 }
  0x31   :  { %2375 = vmatprep.mubr.msk.f32.mxu0 %vm103_vm0, %v71_v25 }
  0x34   :  { %2376 = vmatmul.mubr.msk.f32.gmra.mxu0 %vm103_vm0, %v72_v26 }
  0x35   :  { %2378 = vmatprep.mubr.msk.f32.mxu0 %vm103_vm0, %v73_v27 }
  0x38   :  { %2379 = vmatmul.mubr.msk.f32.gmra.mxu0 %vm103_vm0, %v74_v28 }
  0x39   :  { %2381 = vmatprep.mubr.msk.f32.mxu0 %vm103_vm0, %v75_v29 }
  0x3c   :  { %2382 = vmatmul.mubr.msk.f32.gmra.mxu0 %vm103_vm0, %v76_v30 }
  0x3d   :  { %2384 = vmatprep.mubr.msk.f32.mxu0 %vm103_vm0, %v77_v31 }
  0x40   :  { %2385 = vmatmul.mubr.msk.f32.gmra.mxu0 %vm103_vm0, %v78_v32 }
  0x41   :  { %2387 = vmatprep.mubr.msk.f32.mxu0 %vm103_vm0, %v79_v33 }
  0x44   :  { %2388 = vmatmul.mubr.msk.f32.gmra.mxu0 %vm103_vm0, %v80_v34 }
  0x45   :  { %2390 = vmatprep.mubr.msk.f32.mxu0 %vm103_vm0, %v81_v35 }
  0x48   :  { %2391 = vmatmul.mubr.msk.f32.gmra.mxu0 %vm103_vm0, %v82_v36 }
  0x49   :  { %2393 = vmatprep.mubr.msk.f32.mxu0 %vm103_vm0, %v83_v37 }
  0x4c   :  { %2394 = vmatmul.mubr.msk.f32.gmra.mxu0 %vm103_vm0, %v84_v38 }
  0x4d   :  { %2396 = vmatprep.mubr.msk.f32.mxu0 %vm103_vm0, %v85_v39 }
  0x50   :  { %2397 = vmatmul.mubr.msk.f32.gmra.mxu0 %vm103_vm0, %v86_v40 }
  0x51   :  { %2399 = vmatprep.mubr.msk.f32.mxu0 %vm103_vm0, %v87_v41 }
  0x54   :  { %2400 = vmatmul.mubr.msk.f32.gmra.mxu0 %vm103_vm0, %v88_v42 }
  0x55   :  { %2402 = vmatprep.mubr.msk.f32.mxu0 %vm103_vm0, %v89_v43 }
  0x58   :  { %2403 = vmatmul.mubr.msk.f32.gmra.mxu0 %vm103_vm0, %v90_v44 }
  0x59   :  { %2405 = vmatprep.mubr.msk.f32.mxu0 %vm103_vm0, %v91_v45 }
  0x5c   :  { %2406 = vmatmul.mubr.msk.f32.gmra.mxu0 %vm103_vm0, %v92_v46 }
  0x5d   :  { %2408 = vmatprep.mubr.msk.f32.mxu0 %vm103_vm0, %v93_v47 }
  0x60   :  { %2409 = vmatmul.mubr.msk.f32.gmra.mxu0 %vm103_vm0, %v94_v48 }
  0x61   :  { %2411 = vmatprep.mubr.msk.f32.mxu0 %vm103_vm0, %v95_v49 }
  0x64   :  { %2412 = vmatmul.mubr.msk.f32.gmra.mxu0 %vm103_vm0, %v96_v50 }
  0x65   :  { %2414 = vmatprep.mubr.msk.f32.mxu0 %vm103_vm0, %v97_v51 }
  0x68   :  { %2415 = vmatmul.mubr.msk.f32.gmra.mxu0 %vm103_vm0, %v98_v52 }
  0xcc   :  { %v2347_v58 = vpop.f32.mrf.mxu0 }
  0xcd   :  { %v554_v27 = vmul.f32 %v2347_v58, %v2347_v58 }
  0xce   :  { %v314_v59 = vpop.f32.mrf.mxu0 }
  0xcf   :  { %v553_v31 = vmul.f32 %v314_v59, %v314_v59 }
  0xd0   :  { %v2350_v60 = vpop.f32.mrf.mxu0 }
  0xd1   :  { %v556_v34 = vmul.f32 %v2350_v60, %v2350_v60 }
  0xd2   :  { %v324_v61 = vpop.f32.mrf.mxu0 }
  0xd3   :  { %v555_v35 = vmul.f32 %v324_v61, %v324_v61 }
  0xd4   :  { %v2353_v62 = vpop.f32.mrf.mxu0 }
  0xd5   :  { %v558_v36 = vmul.f32 %v2353_v62, %v2353_v62 }
  0xd6   :  { %v334_v63 = vpop.f32.mrf.mxu0 }
  0xd7   :  { %v557_v42 = vmul.f32 %v334_v63, %v334_v63 }
  0xd8   :  { %v2356_v0 = vpop.f32.mrf.mxu0 }
  0xd9   :  { %v560_v43 = vmul.f32 %v2356_v0, %v2356_v0 }
  0xda   :  { %v344_v1 = vpop.f32.mrf.mxu0 }
  0xdb   :  { %v559_v44 = vmul.f32 %v344_v1, %v344_v1 }
  0xdc   :  { %v2359_v2 = vpop.f32.mrf.mxu0 }
  0xdd   :  { %v562_v50 = vmul.f32 %v2359_v2, %v2359_v2 }
  0xde   :  { %v354_v3 = vpop.f32.mrf.mxu0 }
  0xdf   :  { %v561_v51 = vmul.f32 %v354_v3, %v354_v3 }
  0xe0   :  { %v2362_v4 = vpop.f32.mrf.mxu0 }
  0xe1   :  { %v564_v59 = vmul.f32 %v2362_v4, %v2362_v4 }
  0xe2   :  { %v364_v5 = vpop.f32.mrf.mxu0 }
  0xe3   :  { %v563_v60 = vmul.f32 %v364_v5, %v364_v5 }
  0xe4   :  { %v2365_v6 = vpop.f32.mrf.mxu0 }
  0xe5   :  { %v566_v61 = vmul.f32 %v2365_v6, %v2365_v6 }
  0xe6   :  { %v374_v7 = vpop.f32.mrf.mxu0 }
  0xe7   :  { %v565_v62 = vmul.f32 %v374_v7, %v374_v7 }
  0xe8   :  { %v2368_v8 = vpop.f32.mrf.mxu0 }
  0xe9   :  { %v568_v3 = vmul.f32 %v2368_v8, %v2368_v8 }
  0xea   :  { %v2960_v9 = vpop.f32.mrf.mxu0 }
  0xec   :  { %v2371_v10 = vpop.f32.mrf.mxu0 }
  0xed   :  { %v570_v25 = vmul.f32 %v2371_v10, %v2371_v10 }
  0xee   :  { %v394_v11 = vpop.f32.mrf.mxu0 }
  0xef   :  { %v569_v28 = vmul.f32 %v394_v11, %v394_v11  ;;  %v586_v32 = vadd.f32 %v570_v25, %v554_v27 }
  0xf0   :  { %v2374_v12 = vpop.f32.mrf.mxu0 }
  0xf1   :  { %v572_v29 = vmul.f32 %v2374_v12, %v2374_v12  ;;  %v585_v38 = vadd.f32 %v569_v28, %v553_v31 }
  0xf2   :  { %v404_v13 = vpop.f32.mrf.mxu0 }
  0xf3   :  { %v571_v39 = vmul.f32 %v404_v13, %v404_v13  ;;  %v588_v45 = vadd.f32 %v572_v29, %v556_v34 }
  0xf4   :  { %v2377_v14 = vpop.f32.mrf.mxu0 }
  0xf5   :  { %v574_v47 = vmul.f32 %v2377_v14, %v2377_v14  ;;  %v587_v55 = vadd.f32 %v571_v39, %v555_v35 }
  0xf6   :  { %v414_v15 = vpop.f32.mrf.mxu0 }
  0xf7   :  { %v573_v52 = vmul.f32 %v414_v15, %v414_v15  ;;  %v590_v0 = vadd.f32 %v574_v47, %v558_v36 }
  0xf8   :  { %v2380_v16 = vpop.f32.mrf.mxu0 }
  0xf9   :  { %v576_v53 = vmul.f32 %v2380_v16, %v2380_v16  ;;  %v589_v10 = vadd.f32 %v573_v52, %v557_v42 }
  0xfa   :  { %v424_v17 = vpop.f32.mrf.mxu0 }
  0xfb   :  { %v592_v11 = vadd.f32 %v576_v53, %v560_v43  ;;  %v575_v12 = vmul.f32 %v424_v17, %v424_v17  ;;  %v567_v17 = vmul.f32 %v2960_v9, %v2960_v9 }
  0xfc   :  { %v2383_v18 = vpop.f32.mrf.mxu0 }
  0xfd   :  { %v578_v14 = vmul.f32 %v2383_v18, %v2383_v18  ;;  %v591_v18 = vadd.f32 %v575_v12, %v559_v44 }
  0xfe   :  { %v434_v19 = vpop.f32.mrf.mxu0 }
  0xff   :  { %v577_v5 = vmul.f32 %v434_v19, %v434_v19 }
 0x100   :  { %v2386_v20 = vpop.f32.mrf.mxu0 }
 0x101   :  { %v580_v6 = vmul.f32 %v2386_v20, %v2386_v20 }
 0x102   :  { %v444_v21 = vpop.f32.mrf.mxu0 }
 0x103   :  { %v579_v7 = vmul.f32 %v444_v21, %v444_v21  ;;  %v594_v21 = vadd.f32 %v578_v14, %v562_v50  ;;  %v596_v31 = vadd.f32 %v580_v6, %v564_v59  ;;  %v746_v6 = vld [vmem:[%s3768_s4 + $0x8] sm:$0xff] }
 0x104   :  { %v2389_v22 = vpop.f32.mrf.mxu0 }
 0x105   :  { %v582_v16 = vmul.f32 %v2389_v22, %v2389_v22 }
 0x106   :  { %v454_v23 = vpop.f32.mrf.mxu0 }
 0x107   :  { %v581_v27 = vmul.f32 %v454_v23, %v454_v23 }
 0x108   :  { %v2962_v24 = vpop.f32.mrf.mxu0 }
 0x109   :  { %v584_v29 = vmul.f32 %v2962_v24, %v2962_v24  ;;  %v2992_v9 = vadd.f32 %v581_v27, %v565_v62 }
 0x10a   :  { %v2964_v26 = vpop.f32.mrf.mxu0 }
 0x10b   :  { %v583_v19 = vmul.f32 %v2964_v26, %v2964_v26  ;;  %v2997_v36 = vadd.f32 %v584_v29, %v568_v3 }
 0x10c   :  { %v2395_v30 = vpop.f32.mrf.mxu0 }
 0x10d   :  { %v602_v33 = vmul.f32 %v2395_v30, %v2395_v30  ;;  %v593_v30 = vadd.f32 %v577_v5, %v561_v51 }
 0x10e   :  { %v474_v37 = vpop.f32.mrf.mxu0 }
 0x10f   :  { %v2966_v40 = vadd.f32 %v602_v33, %v586_v32  ;;  %v601_v41 = vmul.f32 %v474_v37, %v474_v37  ;;  %v595_v32 = vadd.f32 %v579_v7, %v563_v60  ;;  %v598_v33 = vadd.f32 %v582_v16, %v566_v61 }
 0x110   :  { %v2398_v46 = vpop.f32.mrf.mxu0  ;;  %v2999_v37 = vadd.f32 %v583_v19, %v567_v17 }
 0x111   :  { %2517 = vrsqrt.f32 %v2966_v40  ;;  %v2969_v48 = vadd.f32 %v601_v41, %v585_v38  ;;  %v604_v49 = vmul.f32 %v2398_v46, %v2398_v46  ;;  %vm642_vm1 = vcmp.eq.f32.partialorder %v2966_v40, inf }
 0x112   :  { %v484_v54 = vpop.f32.mrf.mxu0  ;;  %vm644_vm2 = vcmp.eq.f32.partialorder %v2966_v40, 0.0  ;;  %v645_v46 = vand.u32 2147483648, %v2966_v40 }
 0x113   :  { %2519 = vrsqrt.f32 %v2969_v48  ;;  %v2972_v56 = vadd.f32 %v604_v49, %v588_v45  ;;  %v603_v58 = vmul.f32 %v484_v54, %v484_v54  ;;  %vm635_vm3 = vcmp.eq.f32.partialorder %v2969_v48, inf }
 0x114   :  { %v2401_v63 = vpop.f32.mrf.mxu0  ;;  %vm637_vm4 = vcmp.eq.f32.partialorder %v2969_v48, 0.0  ;;  %v638_v45 = vand.u32 2147483648, %v2969_v48 }
 0x115   :  { %2521 = vrsqrt.f32 %v2972_v56  ;;  %v2975_v1 = vadd.f32 %v603_v58, %v587_v55  ;;  %v606_v2 = vmul.f32 %v2401_v63, %v2401_v63  ;;  %vm656_vm5 = vcmp.eq.f32.partialorder %v2972_v56, inf }
 0x116   :  { %v494_v13 = vpop.f32.mrf.mxu0  ;;  %vm658_vm6 = vcmp.eq.f32.partialorder %v2972_v56, 0.0  ;;  %v659_v54 = vand.u32 2147483648, %v2972_v56 }
 0x117   :  { %2523 = vrsqrt.f32 %v2975_v1  ;;  %v2978_v15 = vadd.f32 %v606_v2, %v590_v0  ;;  %v605_v4 = vmul.f32 %v494_v13, %v494_v13  ;;  %vm649_vm7 = vcmp.eq.f32.partialorder %v2975_v1, inf }
 0x118   :  { %v2404_v25 = vpop.f32.mrf.mxu0  ;;  %vm651_vm8 = vcmp.eq.f32.partialorder %v2975_v1, 0.0  ;;  %v652_v12 = vand.u32 2147483648, %v2975_v1 }
 0x119   :  { %2525 = vrsqrt.f32 %v2978_v15  ;;  %v2981_v28 = vadd.f32 %v605_v4, %v589_v10  ;;  %v608_v8 = vmul.f32 %v2404_v25, %v2404_v25  ;;  %vm670_vm9 = vcmp.eq.f32.partialorder %v2978_v15, inf }
 0x11a   :  { %v504_v20 = vpop.f32.mrf.mxu0  ;;  %v673_v17 = vand.u32 2147483648, %v2978_v15  ;;  %vm672_vm12 = vcmp.eq.f32.partialorder %v2978_v15, 0.0 }
 0x11b   :  { %2527 = vrsqrt.f32 %v2981_v28  ;;  %v2990_v22 = vadd.f32 %v608_v8, %v592_v11  ;;  %v607_v23 = vmul.f32 %v504_v20, %v504_v20  ;;  %vm663_vm10 = vcmp.eq.f32.partialorder %v2981_v28, inf }
 0x11c   :  { %v2407_v34 = vpop.f32.mrf.mxu0  ;;  %vm665_vm11 = vcmp.eq.f32.partialorder %v2981_v28, 0.0  ;;  %v666_v20 = vand.u32 2147483648, %v2981_v28 }
 0x11d   :  { %2529 = vrsqrt.f32 %v2990_v22  ;;  %v2995_v24 = vadd.f32 %v607_v23, %v591_v18  ;;  %v610_v35 = vmul.f32 %v2407_v34, %v2407_v34  ;;  %vm684_vm13 = vcmp.eq.f32.partialorder %v2990_v22, inf }
 0x11e   :  { %v2518_v26 = vpop.eup %2517  ;;  %v514_v38 = vpop.f32.mrf.mxu0 }
 0x11f   :  { %2531 = vrsqrt.f32 %v2995_v24  ;;  %v3004_v39 = vadd.f32 %v610_v35, %v594_v21  ;;  %v609_v41 = vmul.f32 %v514_v38, %v514_v38  ;;  %v641_v42 = vmul.f32 %v2518_v26, %v2966_v40 }
 0x120   :  { %v2520_v43 = vpop.eup %2519  ;;  %v2410_v44 = vpop.f32.mrf.mxu0  ;;  %vm677_vm14 = vcmp.eq.f32.partialorder %v2995_v24, inf  ;;  %v687_v38 = vand.u32 2147483648, %v2990_v22  ;;  %vm679_vm15 = vcmp.eq.f32.partialorder %v2995_v24, 0.0 }
 0x121   :  { %2533 = vrsqrt.f32 %v3004_v39  ;;  %v3012_v47 = vadd.f32 %v609_v41, %v593_v30  ;;  %v612_v49 = vmul.f32 %v2410_v44, %v2410_v44  ;;  %v634_v50 = vmul.f32 %v2520_v43, %v2969_v48 }
 0x122   :  { %v2522_v51 = vpop.eup %2521  ;;  %v524_v52 = vpop.f32.mrf.mxu0  ;;  %v643_v53 = vsel %vm642_vm1, %v2966_v40, %v641_v42  ;;  %vm686_vm1 = vcmp.eq.f32.partialorder %v2990_v22, 0.0 }
 0x123   :  { %2535 = vrsqrt.f32 %v3012_v47  ;;  %v3022_v55 = vadd.f32 %v612_v49, %v596_v31  ;;  %v611_v58 = vmul.f32 %v524_v52, %v524_v52  ;;  %v636_v59 = vsel %vm635_vm3, %v2969_v48, %v634_v50  ;;  %v747_v48 = vld [vmem:[%s3768_s4 + $0x10] sm:$0xff] }
 0x124   :  { %v2524_v60 = vpop.eup %2523  ;;  %v2413_v61 = vpop.f32.mrf.mxu0  ;;  %v639_v62 = vsel %vm637_vm4, %v638_v45, %v636_v59  ;;  %v646_v63 = vsel %vm644_vm2, %v645_v46, %v643_v53  ;;  %v655_v0 = vmul.f32 %v2522_v51, %v2972_v56  ;;  %vm698_vm2 = vcmp.eq.f32.partialorder %v3004_v39, inf }
 0x125   :  { %2537 = vrsqrt.f32 %v3022_v55  ;;  %v3034_v2 = vadd.f32 %v611_v58, %v595_v32  ;;  %v614_v3 = vmul.f32 %v2413_v61, %v2413_v61  ;;  %2425 = vmatprep.mubr.msk.f32.mxu1 %vm103_vm0, %v639_v62  ;;  %v648_v10 = vmul.f32 %v2524_v60, %v2975_v1 }
 0x126   :  { %v2526_v11 = vpop.eup %2525  ;;  %v534_v40 = vpop.f32.mrf.mxu0  ;;  %2426 = vmatmul.mubr.msk.f32.vlgmr.msra.gmra.mxu1 %vm103_vm0, %v646_v63  ;;  %v657_v13 = vsel %vm656_vm5, %v2972_v56, %v655_v0  ;;  %v745_v56 = vld [vmem:[%s3768_s4] sm:$0xff]  ;;  %vm691_vm3 = vcmp.eq.f32.partialorder %v3012_v47, inf  ;;  %vm693_vm4 = vcmp.eq.f32.partialorder %v3012_v47, 0.0  ;;  %vm700_vm5 = vcmp.eq.f32.partialorder %v3004_v39, 0.0 }
 0x127   :  { %2539 = vrsqrt.f32 %v3034_v2  ;;  %v3049_v14 = vadd.f32 %v614_v3, %v598_v33  ;;  %v613_v4 = vmul.f32 %v534_v40, %v534_v40  ;;  %2450 = vmatpush3.msra.mxu1 %v2957_v57  ;;  %v650_v5 = vsel %vm649_vm7, %v2975_v1, %v648_v10 }
 0x128   :  { %v2528_v7 = vpop.eup %2527  ;;  %v2416_v16 = vpop.f32.mrf.mxu0  ;;  %v653_v25 = vsel %vm651_vm8, %v652_v12, %v650_v5  ;;  %v660_v27 = vsel %vm658_vm6, %v659_v54, %v657_v13  ;;  %2451 = vmatprep.subr.mxu1 %v747_v48  ;;  %v669_v8 = vmul.f32 %v2526_v11, %v2978_v15  ;;  %vm712_vm6 = vcmp.eq.f32.partialorder %v3022_v55, inf }
 0x129   :  { %2541 = vrsqrt.f32 %v3049_v14  ;;  %v3064_v57 = vadd.f32 %v613_v4, %v2992_v9  ;;  %v616_v1 = vmul.f32 %v2416_v16, %v2416_v16  ;;  %2428 = vmatprep.mubr.msk.f32.mxu1 %vm103_vm0, %v653_v25  ;;  %v662_v18 = vmul.f32 %v2528_v7, %v2981_v28  ;;  %2452 = vmatpush3.msra.mxu1 %v747_v48 }
 0x12a   :  { %v2530_v29 = vpop.eup %2529  ;;  %v544_v19 = vpop.f32.mrf.mxu0  ;;  %2429 = vmatmul.mubr.msk.f32.gmra.mxu1 %vm103_vm0, %v660_v27  ;;  %v671_v21 = vsel %vm670_vm9, %v2978_v15, %v669_v8  ;;  %2453 = vmatprep.subr.mxu1 %v746_v6  ;;  %v680_v15 = vand.u32 2147483648, %v2995_v24  ;;  %vm705_vm7 = vcmp.eq.f32.partialorder %v3034_v2, inf  ;;  %vm707_vm8 = vcmp.eq.f32.partialorder %v3034_v2, 0.0  ;;  %v35_v8 = vld [vmem:[%s3764_s0] sm:$0xff] }
 0x12b   :  { %2543 = vrsqrt.f32 %v3064_v57  ;;  %v3080_v23 = vadd.f32 %v616_v1, %v2997_v36  ;;  %v615_v30 = vmul.f32 %v544_v19, %v544_v19  ;;  %v664_v31 = vsel %vm663_vm10, %v2981_v28, %v662_v18  ;;  %2454 = vmatpush3.msra.mxu1 %v746_v6  ;;  %v37_v1 = vld [vmem:[%s3764_s0 + $0x10] sm:$0xff]  ;;  %v38_v18 = vld [vmem:[%s3764_s0 + $0x18] sm:$0xff] }
 0x12c   :  { %v2532_v32 = vpop.eup %2531  ;;  %v667_v33 = vsel %vm665_vm11, %v666_v20, %v664_v31  ;;  %v683_v34 = vmul.f32 %v2530_v29, %v2990_v22  ;;  %2455 = vmatprep.subr.mxu1 %v745_v56  ;;  %v674_v35 = vsel %vm672_vm12, %v673_v17, %v671_v21  ;;  %vm714_vm9 = vcmp.eq.f32.partialorder %v3022_v55, 0.0  ;;  %v40_v29 = vld [vmem:[%s3764_s0 + $0x28] sm:$0xff]  ;;  %v41_v19 = vld [vmem:[%s3764_s0 + $0x30] sm:$0xff]  ;;  %v42_v20 = vld [vmem:[%s3764_s0 + $0x38] sm:$0xff] }
 0x12d   :  { %2545 = vrsqrt.f32 %v3080_v23  ;;  %v3088_v9 = vadd.f32 %v615_v30, %v2999_v37  ;;  %2431 = vmatprep.mubr.msk.f32.mxu1 %vm103_vm0, %v667_v33  ;;  %v676_v28 = vmul.f32 %v2532_v32, %v2995_v24  ;;  %2456 = vmatpush3.msra.mxu1 %v745_v56  ;;  %vm726_vm10 = vcmp.eq.f32.partialorder %v3049_v14, inf  ;;  %v39_v56 = vld [vmem:[%s3764_s0 + $0x20] sm:$0xff]  ;;  %v45_v30 = vld [vmem:[%s3764_s0 + $0x50] sm:$0xff]  ;;  %v46_v31 = vld [vmem:[%s3764_s0 + $0x58] sm:$0xff] }
 0x12e   :  { %v2534_v26 = vpop.eup %2533  ;;  %2432 = vmatmul.mubr.msk.f32.gmra.mxu1 %vm103_vm0, %v674_v35  ;;  %v685_v36 = vsel %vm684_vm13, %v2990_v22, %v683_v34  ;;  %v701_v22 = vand.u32 2147483648, %v3004_v39  ;;  %vm719_vm11 = vcmp.eq.f32.partialorder %v3064_v57, inf  ;;  %vm721_vm12 = vcmp.eq.f32.partialorder %v3064_v57, 0.0  ;;  %v43_v21 = vld [vmem:[%s3764_s0 + $0x40] sm:$0xff]  ;;  %v48_v33 = vld [vmem:[%s3764_s0 + $0x68] sm:$0xff]  ;;  %v49_v34 = vld [vmem:[%s3764_s0 + $0x70] sm:$0xff] }
 0x12f   :  { %2547 = vrsqrt.f32 %v3088_v9  ;;  %v678_v37 = vsel %vm677_vm14, %v2995_v24, %v676_v28  ;;  %v697_v41 = vmul.f32 %v2534_v26, %v3004_v39  ;;  %v688_v44 = vsel %vm686_vm1, %v687_v38, %v685_v36  ;;  %v47_v32 = vld [vmem:[%s3764_s0 + $0x60] sm:$0xff]  ;;  %v1277_v35 = vld [vmem:[%s3771_s7 + $0x18] sm:$0xff]  ;;  %v1276_v28 = vld [vmem:[%s3771_s7 + $0x10] sm:$0xff] }
 0x130   :  { %v2536_v42 = vpop.eup %2535  ;;  %v681_v43 = vsel %vm679_vm15, %v680_v15, %v678_v37  ;;  %v694_v24 = vand.u32 2147483648, %v3012_v47  ;;  %vm728_vm13 = vcmp.eq.f32.partialorder %v3049_v14, 0.0  ;;  %vm740_vm14 = vcmp.eq.f32.partialorder %v3080_v23, inf  ;;  %2481 = vmatprep.subr.mxu1 %v1277_v35  ;;  %v1275_v26 = vld [vmem:[%s3771_s7 + $0x8] sm:$0xff]  ;;  %v1274_v15 = vld [vmem:[%s3771_s7] sm:$0xff] }
 0x131   :  { %2434 = vmatprep.mubr.msk.f32.mxu1 %vm103_vm0, %v681_v43  ;;  %v690_v45 = vmul.f32 %v2536_v42, %v3012_v47  ;;  %v699_v49 = vsel %vm698_vm2, %v3004_v39, %v697_v41  ;;  %v715_v39 = vand.u32 2147483648, %v3022_v55  ;;  %vm733_vm15 = vcmp.eq.f32.partialorder %v3088_v9, inf }
 0x132   :  { %v2538_v46 = vpop.eup %2537  ;;  %2435 = vmatmul.mubr.msk.f32.gmra.mxu1 %vm103_vm0, %v688_v44  ;;  %v702_v54 = vsel %vm700_vm5, %v701_v22, %v699_v49  ;;  %v736_v7 = vand.u32 2147483648, %v3088_v9  ;;  %vm735_vm1 = vcmp.eq.f32.partialorder %v3088_v9, 0.0  ;;  %vm742_vm2 = vcmp.eq.f32.partialorder %v3080_v23, 0.0 }
 0x133   :  { %v692_v50 = vsel %vm691_vm3, %v3012_v47, %v690_v45  ;;  %v711_v51 = vmul.f32 %v2538_v46, %v3022_v55  ;;  %v708_v47 = vand.u32 2147483648, %v3034_v2  ;;  %vm1832_vm3 = vcmask 130112  }
 0x134   :  { %v2540_v52 = vpop.eup %2539  ;;  %v695_v53 = vsel %vm693_vm4, %v694_v24, %v692_v50  ;;  %vm1846_vm4 = vcmask 261312   ;;  %vm1853_vm5 = vcmask 326912  }
 0x135   :  { %2437 = vmatprep.mubr.msk.f32.mxu1 %vm103_vm0, %v695_v53  ;;  %v704_v58 = vmul.f32 %v2540_v52, %v3034_v2  ;;  %v713_v60 = vsel %vm712_vm6, %v3022_v55, %v711_v51  ;;  %v729_v55 = vand.u32 2147483648, %v3049_v14  ;;  %vm1860_vm6 = vcmask 392512  }
 0x136   :  { %v2542_v59 = vpop.eup %2541  ;;  %2438 = vmatmul.mubr.msk.f32.gmra.mxu1 %vm103_vm0, %v702_v54  ;;  %v716_v3 = vsel %vm714_vm9, %v715_v39, %v713_v60  ;;  %vm1881_vm9 = vcmask 589312  }
 0x137   :  { %v706_v61 = vsel %vm705_vm7, %v3034_v2, %v704_v58  ;;  %v725_v62 = vmul.f32 %v2542_v59, %v3049_v14  ;;  %v722_v2 = vand.u32 2147483648, %v3064_v57  ;;  %v3238_v58 = vld [vmem:[%s3770_s6] ss:$0 sm:$0xff]  ;;  %vm1867_vm7 = vcmask 458112  }
 0x138   :  { %v2544_v63 = vpop.eup %2543  ;;  %v709_v0 = vsel %vm707_vm8, %v708_v47, %v706_v61  ;;  %vm1874_vm8 = vcmask 523712  }
 0x139   :  { %2440 = vmatprep.mubr.msk.f32.mxu1 %vm103_vm0, %v709_v0  ;;  %v718_v10 = vmul.f32 %v2544_v63, %v3064_v57  ;;  %v727_v11 = vsel %vm726_vm10, %v3049_v14, %v725_v62  ;;  %v743_v14 = vand.u32 2147483648, %v3080_v23  ;;  %vm1888_vm10 = vcmask 654912  }
 0x13a   :  { %v2546_v48 = vpop.eup %2545  ;;  %2441 = vmatmul.mubr.msk.f32.gmra.mxu1 %vm103_vm0, %v716_v3  ;;  %v730_v5 = vsel %vm728_vm13, %v729_v55, %v727_v11  ;;  %vm1909_vm13 = vcmask 851712  }
 0x13b   :  { %v720_v40 = vsel %vm719_vm11, %v3064_v57, %v718_v10  ;;  %v739_v12 = vmul.f32 %v2546_v48, %v3080_v23  ;;  %v36_v57 = vld [vmem:[%s3764_s0 + $0x8] sm:$0xff]  ;;  %vm1895_vm11 = vcmask 720512  }
 0x13c   :  { %v2548_v13 = vpop.eup %2547  ;;  %v723_v4 = vsel %vm721_vm12, %v722_v2, %v720_v40  ;;  %vm1902_vm12 = vcmask 786112  }
 0x13d   :  { %2443 = vmatprep.mubr.msk.f32.mxu1 %vm103_vm0, %v723_v4  ;;  %v732_v6 = vmul.f32 %v2548_v13, %v3088_v9  ;;  %v741_v16 = vsel %vm740_vm14, %v3080_v23, %v739_v12  ;;  %v44_v23 = vld [vmem:[%s3764_s0 + $0x48] sm:$0xff]  ;;  %vm1916_vm14 = vcmask 917312  }
 0x13e   :  { %2444 = vmatmul.mubr.msk.f32.gmra.mxu1 %vm103_vm0, %v730_v5  ;;  %v744_v17 = vsel %vm742_vm2, %v743_v14, %v741_v16  ;;  %vm2090_vm2 = vcmask 1041409  }
 0x13f   :  { %v734_v25 = vsel %vm733_vm15, %v3088_v9, %v732_v6  ;;  %v50_v9 = vld [vmem:[%s3764_s0 + $0x78] sm:$0xff]  ;;  %vm1923_vm15 = vcmask 982912  }
 0x140   :  { %v737_v27 = vsel %vm735_vm1, %v736_v7, %v734_v25  ;;  %vm1930_vm1 = vcmask 1048512  }
 0x141   :  { %2446 = vmatprep.mubr.msk.f32.mxu1 %vm103_vm0, %v737_v27 }
 0x142   :  { %2447 = vmatmul.mubr.msk.f32.gmra.mxu1 %vm103_vm0, %v744_v17 }
 0x143   :  { %2457 = vmatprep.mubr.msk.f32.mxu1 %vm103_vm0, %v35_v8 }
 0x146   :  { %2458 = vmatmul.mubr.msk.f32.vlgmr.msra.gmra.mxu1 %vm103_vm0, %v36_v57 }
 0x147   :  { %2460 = vmatprep.mubr.msk.f32.mxu1 %vm103_vm0, %v37_v1  ;;  %2482 = vmatpush3.msra.mxu1 %v1277_v35 }
 0x148   :  { %2483 = vmatprep.subr.mxu1 %v1276_v28 }
 0x149   :  { %2484 = vmatpush3.msra.mxu1 %v1276_v28 }
 0x14a   :  { %2461 = vmatmul.mubr.msk.f32.gmra.mxu1 %vm103_vm0, %v38_v18  ;;  %2485 = vmatprep.subr.mxu1 %v1275_v26 }
 0x14b   :  { %2463 = vmatprep.mubr.msk.f32.mxu1 %vm103_vm0, %v39_v56  ;;  %2486 = vmatpush3.msra.mxu1 %v1275_v26 }
 0x14c   :  { %2487 = vmatprep.subr.mxu1 %v1274_v15 }
 0x14d   :  { %2488 = vmatpush3.msra.mxu1 %v1274_v15 }
 0x14e   :  { %2464 = vmatmul.mubr.msk.f32.gmra.mxu1 %vm103_vm0, %v40_v29 }
 0x14f   :  { %2466 = vmatprep.mubr.msk.f32.mxu1 %vm103_vm0, %v41_v19 }
 0x152   :  { %2467 = vmatmul.mubr.msk.f32.gmra.mxu1 %vm103_vm0, %v42_v20 }
 0x153   :  { %2469 = vmatprep.mubr.msk.f32.mxu1 %vm103_vm0, %v43_v21 }
 0x156   :  { %2470 = vmatmul.mubr.msk.f32.gmra.mxu1 %vm103_vm0, %v44_v23 }
 0x157   :  { %2472 = vmatprep.mubr.msk.f32.mxu1 %vm103_vm0, %v45_v30 }
 0x15a   :  { %2473 = vmatmul.mubr.msk.f32.gmra.mxu1 %vm103_vm0, %v46_v31 }
 0x15b   :  { %2475 = vmatprep.mubr.msk.f32.mxu1 %vm103_vm0, %v47_v32 }
 0x15e   :  { %2476 = vmatmul.mubr.msk.f32.gmra.mxu1 %vm103_vm0, %v48_v33 }
 0x15f   :  { %2478 = vmatprep.mubr.msk.f32.mxu1 %vm103_vm0, %v49_v34 }
 0x162   :  { %2479 = vmatmul.mubr.msk.f32.gmra.mxu1 %vm103_vm0, %v50_v9 }
 0x1e6   :  { %v2427_v36 = vpop.f32.mrf.mxu1 }
 0x1e8   :  { %v867_v38 = vpop.f32.mrf.mxu1 }
 0x1ea   :  { %v2430_v37 = vpop.f32.mrf.mxu1 }
 0x1ec   :  { %v877_v41 = vpop.f32.mrf.mxu1 }
 0x1ee   :  { %v2433_v42 = vpop.f32.mrf.mxu1 }
 0x1f0   :  { %v887_v43 = vpop.f32.mrf.mxu1 }
 0x1f2   :  { %v2436_v44 = vpop.f32.mrf.mxu1 }
 0x1f4   :  { %v897_v45 = vpop.f32.mrf.mxu1 }
 0x1f6   :  { %v2439_v46 = vpop.f32.mrf.mxu1 }
 0x1f8   :  { %v907_v24 = vpop.f32.mrf.mxu1 }
 0x1fa   :  { %v2442_v49 = vpop.f32.mrf.mxu1 }
 0x1fc   :  { %v917_v50 = vpop.f32.mrf.mxu1 }
 0x1fe   :  { %v3227_v22 = vpop.f32.mrf.mxu1 }
 0x200   :  { %v3229_v51 = vpop.f32.mrf.mxu1 }
 0x202   :  { %v3231_v52 = vpop.f32.mrf.mxu1 }
 0x204   :  { %v3233_v53 = vpop.f32.mrf.mxu1 }
 0x206   :  { %v2459_v54 = vpop.f32.mrf.mxu1 }
 0x207   :  { %v1066_v59 = vadd.f32 %v2459_v54, %v2427_v36 }
 0x208   :  { %v1060_v47 = vpop.f32.mrf.mxu1 }
 0x209   :  { %v3241_v60 = vadd.f32 %v3238_v58, %v1066_v59  ;;  %v1061_v61 = vadd.f32 %v1060_v47, %v867_v38 }
 0x20a   :  { %v2462_v39 = vpop.f32.mrf.mxu1 }
 0x20b   :  { %v2192_v62 = vmul.f32 -1.442695, %v3241_v60  ;;  %v3245_v63 = vadd.f32 %v3238_v58, %v1061_v61  ;;  %v1076_v0 = vadd.f32 %v2462_v39, %v2430_v37 }
 0x20c   :  { %v1070_v3 = vpop.f32.mrf.mxu1 }
 0x20d   :  { %2549 = vpow2.f32 %v2192_v62  ;;  %v2191_v10 = vmul.f32 -1.442695, %v3245_v63  ;;  %v3249_v48 = vadd.f32 %v3238_v58, %v1076_v0  ;;  %v1071_v2 = vadd.f32 %v1070_v3, %v877_v41 }
 0x20e   :  { %v2465_v11 = vpop.f32.mrf.mxu1 }
 0x20f   :  { %2551 = vpow2.f32 %v2191_v10  ;;  %v2194_v40 = vmul.f32 -1.442695, %v3249_v48  ;;  %v3253_v55 = vadd.f32 %v3238_v58, %v1071_v2  ;;  %v1086_v12 = vadd.f32 %v2465_v11, %v2433_v42 }
 0x210   :  { %v1080_v13 = vpop.f32.mrf.mxu1 }
 0x211   :  { %2553 = vpow2.f32 %v2194_v40  ;;  %v2193_v4 = vmul.f32 -1.442695, %v3253_v55  ;;  %v3257_v5 = vadd.f32 %v3238_v58, %v1086_v12  ;;  %v1081_v6 = vadd.f32 %v1080_v13, %v887_v43 }
 0x212   :  { %v2468_v7 = vpop.f32.mrf.mxu1 }
 0x213   :  { %2555 = vpow2.f32 %v2193_v4  ;;  %v2196_v16 = vmul.f32 -1.442695, %v3257_v5  ;;  %v3261_v25 = vadd.f32 %v3238_v58, %v1081_v6  ;;  %v1096_v14 = vadd.f32 %v2468_v7, %v2436_v44 }
 0x214   :  { %v1090_v27 = vpop.f32.mrf.mxu1 }
 0x215   :  { %2557 = vpow2.f32 %v2196_v16  ;;  %v2195_v8 = vmul.f32 -1.442695, %v3261_v25  ;;  %v3265_v17 = vadd.f32 %v3238_v58, %v1096_v14  ;;  %v1091_v57 = vadd.f32 %v1090_v27, %v897_v45 }
 0x216   :  { %v2471_v1 = vpop.f32.mrf.mxu1 }
 0x217   :  { %2559 = vpow2.f32 %v2195_v8  ;;  %v2198_v18 = vmul.f32 -1.442695, %v3265_v17  ;;  %v3269_v56 = vadd.f32 %v3238_v58, %v1091_v57  ;;  %v1106_v29 = vadd.f32 %v2471_v1, %v2439_v46 }
 0x218   :  { %v1100_v19 = vpop.f32.mrf.mxu1 }
 0x219   :  { %2561 = vpow2.f32 %v2198_v18  ;;  %v2197_v20 = vmul.f32 -1.442695, %v3269_v56  ;;  %v3273_v21 = vadd.f32 %v3238_v58, %v1106_v29  ;;  %v1101_v23 = vadd.f32 %v1100_v19, %v907_v24 }
 0x21a   :  { %v2550_v30 = vpop.eup %2549  ;;  %v2474_v31 = vpop.f32.mrf.mxu1 }
 0x21b   :  { %v1211_v32 = vadd.f32 1.0, %v2550_v30  ;;  %2563 = vpow2.f32 %v2197_v20  ;;  %v2200_v33 = vmul.f32 -1.442695, %v3273_v21  ;;  %v3277_v34 = vadd.f32 %v3238_v58, %v1101_v23 }
 0x21c   :  { %v2552_v9 = vpop.eup %2551  ;;  %v1116_v35 = vadd.f32 %v2474_v31, %v2442_v49  ;;  %v1110_v28 = vpop.f32.mrf.mxu1 }
 0x21d   :  { %2565 = vrcp.f32 %v1211_v32  ;;  %v1210_v26 = vadd.f32 1.0, %v2552_v9  ;;  %v2199_v15 = vmul.f32 -1.442695, %v3277_v34  ;;  %v1111_v36 = vadd.f32 %v1110_v28, %v917_v50 }
 0x21e   :  { %v2554_v38 = vpop.eup %2553  ;;  %2567 = vpow2.f32 %v2200_v33  ;;  %v3281_v37 = vadd.f32 %v3238_v58, %v1116_v35  ;;  %v2477_v41 = vpop.f32.mrf.mxu1 }
 0x21f   :  { %2569 = vrcp.f32 %v1210_v26  ;;  %v1213_v42 = vadd.f32 1.0, %v2554_v38  ;;  %v3284_v43 = vadd.f32 %v3238_v58, %v1111_v36  ;;  %v1126_v44 = vadd.f32 %v2477_v41, %v3227_v22 }
 0x220   :  { %v2556_v45 = vpop.eup %2555  ;;  %2571 = vpow2.f32 %v2199_v15  ;;  %v2202_v46 = vmul.f32 -1.442695, %v3281_v37  ;;  %v1120_v24 = vpop.f32.mrf.mxu1 }
 0x221   :  { %2573 = vrcp.f32 %v1213_v42  ;;  %v1212_v49 = vadd.f32 1.0, %v2556_v45  ;;  %v2201_v50 = vmul.f32 -1.442695, %v3284_v43  ;;  %v3290_v54 = vadd.f32 %v3238_v58, %v1126_v44 }
 0x222   :  { %v2558_v59 = vpop.eup %2557  ;;  %2575 = vpow2.f32 %v2202_v46  ;;  %v1121_v47 = vadd.f32 %v1120_v24, %v3229_v51  ;;  %v2480_v61 = vpop.f32.mrf.mxu1 }
 0x223   :  { %2577 = vrcp.f32 %v1212_v49  ;;  %v1215_v39 = vadd.f32 1.0, %v2558_v59  ;;  %v2204_v22 = vmul.f32 -1.442695, %v3290_v54  ;;  %v1136_v62 = vadd.f32 %v2480_v61, %v3231_v52 }
 0x224   :  { %v2560_v0 = vpop.eup %2559  ;;  %2579 = vpow2.f32 %v2201_v50  ;;  %v3296_v3 = vadd.f32 %v3238_v58, %v1121_v47  ;;  %v1130_v10 = vpop.f32.mrf.mxu1 }
 0x225   :  { %2581 = vrcp.f32 %v1215_v39  ;;  %v1214_v2 = vadd.f32 1.0, %v2560_v0  ;;  %v3299_v11 = vadd.f32 %v3238_v58, %v1136_v62  ;;  %v1131_v51 = vadd.f32 %v1130_v10, %v3233_v53  ;;  %v2207_v0 = vld [vmem:[#allocation2] ss:$0 sm:$0xff] }
 0x226   :  { %v2562_v40 = vpop.eup %2561  ;;  %2583 = vpow2.f32 %v2204_v22  ;;  %v2203_v12 = vmul.f32 -1.442695, %v3296_v3  ;;  %v2683_v62 = vmov 0  }
 0x227   :  { %2585 = vrcp.f32 %v1214_v2  ;;  %v1217_v13 = vadd.f32 1.0, %v2562_v40  ;;  %v2206_v52 = vmul.f32 -1.442695, %v3299_v11  ;;  %v3305_v4 = vadd.f32 %v3238_v58, %v1131_v51  ;;  %2515 = vset.pattern.permute.xlu0 %v2683_v62  ;;  %2516 = vset.pattern.permute.xlu1 %v2683_v62 }
 0x228   :  { %v2564_v6 = vpop.eup %2563  ;;  %2587 = vpow2.f32 %v2203_v12 }
 0x229   :  { %2589 = vrcp.f32 %v1217_v13  ;;  %v1216_v7 = vadd.f32 1.0, %v2564_v6  ;;  %v2205_v16 = vmul.f32 -1.442695, %v3305_v4 }
 0x22a   :  { %v2566_v14 = vpop.eup %2565  ;;  %2591 = vpow2.f32 %v2206_v52 }
 0x22b   :  { %v2568_v53 = vpop.eup %2567  ;;  %2593 = vrcp.f32 %v1216_v7  ;;  %v1259_v58 = vmul.f32 %v2566_v14, %v3241_v60 }
 0x22c   :  { %v2570_v27 = vpop.eup %2569  ;;  %v1219_v8 = vadd.f32 1.0, %v2568_v53  ;;  %2595 = vpow2.f32 %v2205_v16 }
 0x22d   :  { %v2572_v57 = vpop.eup %2571  ;;  %v1258_v1 = vmul.f32 %v2570_v27, %v3245_v63 }
 0x22e   :  { %v2574_v18 = vpop.eup %2573  ;;  %v1218_v29 = vadd.f32 1.0, %v2572_v57  ;;  %2597 = vrcp.f32 %v1219_v8 }
 0x22f   :  { %v2576_v19 = vpop.eup %2575  ;;  %2489 = vmatprep.mubr.msk.f32.mxu1 %vm103_vm0, %v1258_v1  ;;  %v1261_v33 = vmul.f32 %v2574_v18, %v3249_v48 }
 0x230   :  { %v2578_v20 = vpop.eup %2577  ;;  %2599 = vrcp.f32 %v1218_v29  ;;  %v1221_v23 = vadd.f32 1.0, %v2576_v19  ;;  %2490 = vmatmul.mubr.msk.f32.vlgmr.msra.gmra.mxu1 %vm103_vm0, %v1259_v58 }
 0x231   :  { %v2580_v30 = vpop.eup %2579  ;;  %v1260_v31 = vmul.f32 %v2578_v20, %v3253_v55 }
 0x232   :  { %v2582_v32 = vpop.eup %2581  ;;  %v1220_v63 = vadd.f32 1.0, %v2580_v30  ;;  %2601 = vrcp.f32 %v1221_v23 }
 0x233   :  { %v2584_v9 = vpop.eup %2583  ;;  %2492 = vmatprep.mubr.msk.f32.mxu1 %vm103_vm0, %v1260_v31  ;;  %v1263_v36 = vmul.f32 %v2582_v32, %v3257_v5 }
 0x234   :  { %v2586_v60 = vpop.eup %2585  ;;  %2603 = vrcp.f32 %v1220_v63  ;;  %v1223_v35 = vadd.f32 1.0, %v2584_v9  ;;  %2493 = vmatmul.mubr.msk.f32.gmra.mxu1 %vm103_vm0, %v1261_v33 }
 0x235   :  { %v2588_v28 = vpop.eup %2587  ;;  %v1262_v26 = vmul.f32 %v2586_v60, %v3261_v25  ;;  %v3343_v60 = vld [vmem:[%s3767_s3] ss:$0 sm:$0xff] }
 0x236   :  { %v2590_v15 = vpop.eup %2589  ;;  %v1222_v55 = vadd.f32 1.0, %v2588_v28  ;;  %2605 = vrcp.f32 %v1223_v35 }
 0x237   :  { %v2592_v38 = vpop.eup %2591  ;;  %2495 = vmatprep.mubr.msk.f32.mxu1 %vm103_vm0, %v1262_v26  ;;  %v1265_v45 = vmul.f32 %v2590_v15, %v3265_v17  ;;  %v2613_v26 = vld [vmem:[%s3765_s1 + $0x8] sm:$0xff] }
 0x238   :  { %v2594_v48 = vpop.eup %2593  ;;  %2607 = vrcp.f32 %v1222_v55  ;;  %v1225_v41 = vadd.f32 1.0, %v2592_v38  ;;  %2496 = vmatmul.mubr.msk.f32.gmra.mxu1 %vm103_vm0, %v1263_v36  ;;  %v2614_v36 = vld [vmem:[%s3765_s1 + $0x108] sm:$0xff] }
 0x239   :  { %v2596_v42 = vpop.eup %2595  ;;  %v1264_v44 = vmul.f32 %v2594_v48, %v3269_v56 }
 0x23a   :  { %v1224_v46 = vadd.f32 1.0, %v2596_v42  ;;  %2609 = vrcp.f32 %v1225_v41 }
 0x23b   :  { %2498 = vmatprep.mubr.msk.f32.mxu1 %vm103_vm0, %v1264_v44  ;;  %v2598_v5 = vpop.eup %2597 }
 0x23c   :  { %2611 = vrcp.f32 %v1224_v46  ;;  %2499 = vmatmul.mubr.msk.f32.gmra.mxu1 %vm103_vm0, %v1265_v45  ;;  %v1267_v49 = vmul.f32 %v2598_v5, %v3273_v21  ;;  %v2615_v45 = vld [vmem:[%s3765_s1 + $0x88] sm:$0xff]  ;;  %v2616_v5 = vld [vmem:[%s3765_s1] sm:$0xff] }
 0x23d   :  { %v2600_v25 = vpop.eup %2599 }
 0x23e   :  { %v1266_v24 = vmul.f32 %v2600_v25, %v3277_v34 }
 0x23f   :  { %v2602_v50 = vpop.eup %2601 }
 0x240   :  { %2501 = vmatprep.mubr.msk.f32.mxu1 %vm103_vm0, %v1266_v24  ;;  %v1269_v56 = vmul.f32 %v2602_v50, %v3281_v37 }
 0x241   :  { %v2604_v59 = vpop.eup %2603  ;;  %2502 = vmatmul.mubr.msk.f32.gmra.mxu1 %vm103_vm0, %v1267_v49 }
 0x242   :  { %v1268_v17 = vmul.f32 %v2604_v59, %v3284_v43 }
 0x243   :  { %v2606_v47 = vpop.eup %2605 }
 0x244   :  { %2504 = vmatprep.mubr.msk.f32.mxu1 %vm103_vm0, %v1268_v17  ;;  %v1271_v21 = vmul.f32 %v2606_v47, %v3290_v54  ;;  %v2617_v17 = vld [vmem:[%s3765_s1 + $0x100] sm:$0xff] }
 0x245   :  { %v2608_v61 = vpop.eup %2607  ;;  %2505 = vmatmul.mubr.msk.f32.gmra.mxu1 %vm103_vm0, %v1269_v56  ;;  %v2618_v47 = vld [vmem:[%s3765_s1 + $0x80] sm:$0xff] }
 0x246   :  { %v1270_v34 = vmul.f32 %v2608_v61, %v3296_v3 }
 0x247   :  { %v2610_v39 = vpop.eup %2609 }
 0x248   :  { %2507 = vmatprep.mubr.msk.f32.mxu1 %vm103_vm0, %v1270_v34  ;;  %v1273_v37 = vmul.f32 %v2610_v39, %v3299_v11  ;;  %v2619_v34 = vld [vmem:[%s3765_s1 + $0x18] sm:$0xff] }
 0x249   :  { %v2612_v22 = vpop.eup %2611  ;;  %2508 = vmatmul.mubr.msk.f32.gmra.mxu1 %vm103_vm0, %v1271_v21 }
 0x24a   :  { %v1272_v43 = vmul.f32 %v2612_v22, %v3305_v4 }
 0x24c   :  { %2510 = vmatprep.mubr.msk.f32.mxu1 %vm103_vm0, %v1272_v43 }
 0x24d   :  { %2511 = vmatmul.mubr.msk.f32.gmra.mxu1 %vm103_vm0, %v1273_v37  ;;  %v2620_v37 = vld [vmem:[%s3765_s1 + $0x98] sm:$0xff] }
 0x2f0   :  { %v2491_v3 = vpop.f32.mrf.mxu1 }
 0x2f1   :  { %v1405_v54 = vadd.f32 %v2491_v3, %v2207_v0  ;;  %v2621_v3 = vld [vmem:[%s3765_s1 + $0x118] sm:$0xff] }
 0x2f2   :  { %v1399_v10 = vpop.f32.mrf.mxu1 }
 0x2f3   :  { %1486 = vperm.xlu0 %2515, %v1405_v54   ;;  %v1400_v51 = vadd.f32 %v2207_v0, %v1399_v10 }
 0x2f4   :  { %v2494_v2 = vpop.f32.mrf.mxu1 }
 0x2f5   :  { %v1415_v40 = vadd.f32 %v2494_v2, %v2207_v0 }
 0x2f6   :  { %v1409_v12 = vpop.f32.mrf.mxu1 }
 0x2f7   :  { %1496 = vperm.xlu1 %2516, %v1415_v40   ;;  %1481 = vperm.xlu0 %2515, %v1400_v51   ;;  %v1410_v11 = vadd.f32 %v2207_v0, %v1409_v12  ;;  %v2622_v40 = vld [vmem:[%s3765_s1 + $0x110] sm:$0xff] }
 0x2f8   :  { %v2497_v13 = vpop.f32.mrf.mxu1 }
 0x2f9   :  { %v1425_v7 = vadd.f32 %v2497_v13, %v2207_v0 }
 0x2fa   :  { %v1419_v52 = vpop.f32.mrf.mxu1 }
 0x2fb   :  { %v1420_v4 = vadd.f32 %v2207_v0, %v1419_v52  ;;  %1491 = vperm.xlu1 %2516, %v1410_v11  }
 0x2fc   :  { %v2500_v6 = vpop.f32.mrf.mxu1 }
 0x2fd   :  { %1501 = vperm.xlu0 %2515, %v1420_v4   ;;  %v1435_v53 = vadd.f32 %v2500_v6, %v2207_v0  ;;  %v2623_v6 = vld [vmem:[%s3765_s1 + $0x28] sm:$0xff] }
 0x2fe   :  { %v1429_v16 = vpop.f32.mrf.mxu1 }
 0x2ff   :  { %v1430_v14 = vadd.f32 %v2207_v0, %v1429_v16  ;;  %1506 = vperm.xlu1 %2516, %v1425_v7   ;;  %v2624_v16 = vld [vmem:[%s3765_s1 + $0x10] sm:$0xff] }
 0x301   :  { %v2503_v27 = vpop.f32.mrf.mxu1  ;;  %1511 = vperm.xlu0 %2515, %v1430_v14  }
 0x302   :  { %v1445_v1 = vadd.f32 %v2503_v27, %v2207_v0 }
 0x303   :  { %v1439_v8 = vpop.f32.mrf.mxu1  ;;  %1516 = vperm.xlu1 %2516, %v1435_v53   ;;  %v2625_v53 = vld [vmem:[%s3765_s1 + $0x90] sm:$0xff] }
 0x304   :  { %v1440_v57 = vadd.f32 %v2207_v0, %v1439_v8 }
 0x305   :  { %v2506_v18 = vpop.f32.mrf.mxu1 }
 0x306   :  { %1521 = vperm.xlu0 %2515, %v1440_v57   ;;  %v1455_v19 = vadd.f32 %v2506_v18, %v2207_v0 }
 0x307   :  { %v1449_v58 = vpop.f32.mrf.mxu1  ;;  %1526 = vperm.xlu1 %2516, %v1445_v1   ;;  %v2626_v1 = vld [vmem:[%s3765_s1 + $0xa0] sm:$0xff] }
 0x308   :  { %v1450_v29 = vadd.f32 %v2207_v0, %v1449_v58 }
 0x309   :  { %v2509_v20 = vpop.f32.mrf.mxu1 }
 0x30a   :  { %1531 = vperm.xlu0 %2515, %v1450_v29   ;;  %v1465_v31 = vadd.f32 %v2509_v20, %v2207_v0 }
 0x30b   :  { %v1459_v23 = vpop.f32.mrf.mxu1  ;;  %1536 = vperm.xlu1 %2516, %v1455_v19  }
 0x30c   :  { %v1460_v30 = vadd.f32 %v2207_v0, %v1459_v23 }
 0x30d   :  { %v2512_v32 = vpop.f32.mrf.mxu1 }
 0x30e   :  { %1541 = vperm.xlu0 %2515, %v1460_v30   ;;  %v1475_v9 = vadd.f32 %v2512_v32, %v2207_v0  ;;  %v2627_v30 = vld [vmem:[%s3765_s1 + $0xa8] sm:$0xff]  ;;  %v2628_v32 = vld [vmem:[%s3765_s1 + $0x120] sm:$0xff] }
 0x30f   :  { %v1469_v33 = vpop.f32.mrf.mxu1  ;;  %1546 = vperm.xlu1 %2516, %v1465_v31  }
 0x310   :  { %v1470_v63 = vadd.f32 %v2207_v0, %v1469_v33 }
 0x312   :  { %1551 = vperm.xlu0 %2515, %v1470_v63  }
 0x313   :  { %1556 = vperm.xlu1 %2516, %v1475_v9  }
 0x36e   :  { %v1487_v35 = vpop.permute.xlu0 %1486 }
 0x36f   :  { %v1566_v28 = vmul.f32 %v3343_v60, %v1487_v35 }
 0x371   :  { %v1582_v15 = vmul.f32 %v2613_v26, %v1566_v28  ;;  %v1614_v55 = vmul.f32 %v2614_v36, %v1566_v28  ;;  %v1598_v46 = vmul.f32 %v2615_v45, %v1566_v28  ;;  %v2629_v28 = vld [vmem:[%s3765_s1 + $0x128] sm:$0xff] }
 0x372   :  { %v1497_v38 = vpop.permute.xlu1 %1496  ;;  %v1482_v48 = vpop.permute.xlu0 %1481 }
 0x373   :  { %v1565_v41 = vmul.f32 %v3343_v60, %v1482_v48  ;;  %v1632_v42 = vsel %vm103_vm0, %v1582_v15, 0.0  ;;  %v1728_v44 = vsel %vm103_vm0, %v1614_v55, 0.0  ;;  %v1568_v24 = vmul.f32 %v3343_v60, %v1497_v38  ;;  %v2630_v15 = vld [vmem:[%s3765_s1 + $0x38] sm:$0xff]  ;;  %v2631_v55 = vld [vmem:[%s3765_s1 + $0x20] sm:$0xff] }
 0x374   :  { %1633 = vadd.xlane.f32.xlu1 %v1632_v42  ;;  %1729 = vadd.xlane.f32.xlu0 %v1728_v44  ;;  %v1680_v50 = vsel %vm103_vm0, %v1598_v46, 0.0  ;;  %v2632_v42 = vld [vmem:[%s3765_s1 + $0xb0] sm:$0xff] }
 0x375   :  { %v1581_v25 = vmul.f32 %v2616_v5, %v1565_v41  ;;  %v1613_v56 = vmul.f32 %v2617_v17, %v1565_v41  ;;  %v1597_v61 = vmul.f32 %v2618_v47, %v1565_v41  ;;  %v1584_v21 = vmul.f32 %v2619_v34, %v1568_v24 }
 0x376   :  { %v1492_v49 = vpop.permute.xlu1 %1491  ;;  %v1600_v62 = vmul.f32 %v2620_v37, %v1568_v24  ;;  %v1616_v54 = vmul.f32 %v2621_v3, %v1568_v24  ;;  %v2633_v24 = vld [vmem:[%s3765_s1 + $0xb8] sm:$0xff]  ;;  %v2638_v3 = vld [vmem:[%s3765_s1 + $0xc0] sm:$0xff] }
 0x377   :  { %v1629_v59 = vsel %vm103_vm0, %v1581_v25, 0.0  ;;  %v1567_v39 = vmul.f32 %v3343_v60, %v1492_v49  ;;  %v1725_v22 = vsel %vm103_vm0, %v1613_v56, 0.0  ;;  %v1677_v43 = vsel %vm103_vm0, %v1597_v61, 0.0  ;;  %v2635_v56 = vld [vmem:[%s3765_s1 + $0x138] sm:$0xff] }
 0x378   :  { %1681 = vadd.xlane.f32.xlu1 %v1680_v50  ;;  %1630 = vadd.xlane.f32.xlu0 %v1629_v59  ;;  %v1638_v2 = vsel %vm103_vm0, %v1584_v21, 0.0  ;;  %v1686_v51 = vsel %vm103_vm0, %v1600_v62, 0.0  ;;  %v1502_v13 = vpop.permute.xlu0 %1501  ;;  %v1734_v11 = vsel %vm103_vm0, %v1616_v54, 0.0  ;;  %v2634_v50 = vld [vmem:[%s3765_s1 + $0x130] sm:$0xff] }
 0x379   :  { %v1615_v12 = vmul.f32 %v2622_v40, %v1567_v39  ;;  %v1569_v52 = vmul.f32 %v3343_v60, %v1502_v13  ;;  %v1583_v14 = vmul.f32 %v2624_v16, %v1567_v39  ;;  %v1599_v27 = vmul.f32 %v2625_v53, %v1567_v39  ;;  %v2636_v39 = vld [vmem:[%s3765_s1 + $0x48] sm:$0xff] }
 0x37a   :  { %v1507_v0 = vpop.permute.xlu1 %1506 }
 0x37b   :  { %v1570_v10 = vmul.f32 %v3343_v60, %v1507_v0  ;;  %v1731_v4 = vsel %vm103_vm0, %v1615_v12, 0.0  ;;  %v1635_v57 = vsel %vm103_vm0, %v1583_v14, 0.0  ;;  %v1601_v18 = vmul.f32 %v2626_v1, %v1569_v52  ;;  %v2639_v12 = vld [vmem:[%s3765_s1 + $0xc8] sm:$0xff] }
 0x37c   :  { %1726 = vadd.xlane.f32.xlu1 %v1725_v22  ;;  %1678 = vadd.xlane.f32.xlu0 %v1677_v43  ;;  %v1683_v29 = vsel %vm103_vm0, %v1599_v27, 0.0  ;;  %v1512_v19 = vpop.permute.xlu0 %1511  ;;  %v1617_v33 = vmul.f32 %v2628_v32, %v1569_v52  ;;  %v1585_v38 = vmul.f32 %v2631_v55, %v1569_v52  ;;  %v2637_v43 = vld [vmem:[%s3765_s1 + $0x30] sm:$0xff]  ;;  %v2642_v27 = vld [vmem:[%s3765_s1 + $0x58] sm:$0xff] }
 0x37d   :  { %v1586_v7 = vmul.f32 %v2623_v6, %v1570_v10  ;;  %v1689_v23 = vsel %vm103_vm0, %v1601_v18, 0.0  ;;  %v1602_v31 = vmul.f32 %v2627_v30, %v1570_v10  ;;  %v1571_v63 = vmul.f32 %v3343_v60, %v1512_v19  ;;  %v2641_v6 = vld [vmem:[%s3765_s1 + $0x148] sm:$0xff]  ;;  %v2645_v32 = vld [vmem:[%s3765_s1 + $0xd8] sm:$0xff] }
 0x37e   :  { %v1517_v58 = vpop.permute.xlu1 %1516  ;;  %v1737_v35 = vsel %vm103_vm0, %v1617_v33, 0.0  ;;  %v1618_v26 = vmul.f32 %v2629_v28, %v1570_v10  ;;  %v1641_v46 = vsel %vm103_vm0, %v1585_v38, 0.0  ;;  %v2647_v28 = vld [vmem:[%s3765_s1 + $0x158] sm:$0xff]  ;;  %v2648_v38 = vld [vmem:[%s3765_s1 + $0x68] sm:$0xff] }
 0x37f   :  { %v1644_v8 = vsel %vm103_vm0, %v1586_v7, 0.0  ;;  %v1572_v20 = vmul.f32 %v3343_v60, %v1517_v58  ;;  %v1692_v9 = vsel %vm103_vm0, %v1602_v31, 0.0  ;;  %v1603_v44 = vmul.f32 %v2632_v42, %v1571_v63 }
 0x380   :  { %1639 = vadd.xlane.f32.xlu1 %v1638_v2  ;;  %1687 = vadd.xlane.f32.xlu0 %v1686_v51  ;;  %v1740_v48 = vsel %vm103_vm0, %v1618_v26, 0.0  ;;  %v1619_v59 = vmul.f32 %v2634_v50, %v1571_v63  ;;  %v1587_v37 = vmul.f32 %v2637_v43, %v1571_v63  ;;  %v2646_v63 = vld [vmem:[%s3765_s1 + $0x150] sm:$0xff] }
 0x381   :  { %v1588_v36 = vmul.f32 %v2630_v15, %v1572_v20  ;;  %v1695_v25 = vsel %vm103_vm0, %v1603_v44, 0.0  ;;  %v1604_v49 = vmul.f32 %v2633_v24, %v1572_v20  ;;  %v1522_v17 = vpop.permute.xlu0 %1521  ;;  %v1620_v47 = vmul.f32 %v2635_v56, %v1572_v20  ;;  %v2652_v56 = vld [vmem:[%s3765_s1 + $0x160] sm:$0xff] }
 0x382   :  { %v1527_v45 = vpop.permute.xlu1 %1526  ;;  %v1573_v61 = vmul.f32 %v3343_v60, %v1522_v17  ;;  %v1743_v21 = vsel %vm103_vm0, %v1619_v59, 0.0  ;;  %v1647_v2 = vsel %vm103_vm0, %v1587_v37, 0.0  ;;  %v2651_v59 = vld [vmem:[%s3765_s1 + $0xe8] sm:$0xff]  ;;  %v2654_v37 = vld [vmem:[%s3765_s1 + $0x78] sm:$0xff] }
 0x383   :  { %v1650_v41 = vsel %vm103_vm0, %v1588_v36, 0.0  ;;  %v1574_v5 = vmul.f32 %v3343_v60, %v1527_v45  ;;  %v1698_v34 = vsel %vm103_vm0, %v1604_v49, 0.0  ;;  %v1746_v62 = vsel %vm103_vm0, %v1620_v47, 0.0 }
 0x384   :  { %1732 = vadd.xlane.f32.xlu1 %v1731_v4  ;;  %1735 = vadd.xlane.f32.xlu0 %v1734_v11  ;;  %v1605_v54 = vmul.f32 %v2638_v3, %v1573_v61  ;;  %v2640_v11 = vld [vmem:[%s3765_s1 + $0x140] sm:$0xff] }
 0x385   :  { %v1590_v22 = vmul.f32 %v2636_v39, %v1574_v5  ;;  %v1606_v13 = vmul.f32 %v2639_v12, %v1574_v5  ;;  %v1621_v52 = vmul.f32 %v2640_v11, %v1573_v61  ;;  %v1532_v4 = vpop.permute.xlu0 %1531  ;;  %v1622_v7 = vmul.f32 %v2641_v6, %v1574_v5  ;;  %v2657_v12 = vld [vmem:[%s3765_s1 + $0xf8] sm:$0xff]  ;;  %v2658_v11 = vld [vmem:[%s3765_s1 + $0x170] sm:$0xff] }
 0x386   :  { %v1537_v10 = vpop.permute.xlu1 %1536  ;;  %v1701_v40 = vsel %vm103_vm0, %v1605_v54, 0.0  ;;  %v1575_v16 = vmul.f32 %v3343_v60, %v1532_v4  ;;  %v2655_v54 = vld [vmem:[%s3765_s1 + $0x60] sm:$0xff] }
 0x387   :  { %v1656_v0 = vsel %vm103_vm0, %v1590_v22, 0.0  ;;  %v1576_v51 = vmul.f32 %v3343_v60, %v1537_v10  ;;  %v1704_v14 = vsel %vm103_vm0, %v1606_v13, 0.0  ;;  %v1749_v53 = vsel %vm103_vm0, %v1621_v52, 0.0  ;;  %v2656_v10 = vld [vmem:[%s3765_s1 + $0xf0] sm:$0xff] }
 0x388   :  { %1645 = vadd.xlane.f32.xlu1 %v1644_v8  ;;  %1636 = vadd.xlane.f32.xlu0 %v1635_v57  ;;  %v2643_v57 = vld [vmem:[%s3765_s1 + $0x40] sm:$0xff]  ;;  %v1752_v18 = vsel %vm103_vm0, %v1622_v7, 0.0  ;;  %v2659_v7 = vld [vmem:[%s3765_s1 + $0x70] sm:$0xff] }
 0x389   :  { %v1592_v8 = vmul.f32 %v2642_v27, %v1576_v51  ;;  %v1589_v1 = vmul.f32 %v2643_v57, %v1573_v61  ;;  %v1608_v33 = vmul.f32 %v2645_v32, %v1576_v51  ;;  %v1624_v26 = vmul.f32 %v2647_v28, %v1576_v51 }
 0x38a   :  { %v1547_v20 = vpop.permute.xlu1 %1546  ;;  %v1821_v57 = vlaneseq }
 0x38b   :  { %v1662_v58 = vsel %vm103_vm0, %v1592_v8, 0.0  ;;  %v1578_v30 = vmul.f32 %v3343_v60, %v1547_v20  ;;  %v1710_v36 = vsel %vm103_vm0, %v1608_v33, 0.0  ;;  %v1758_v44 = vsel %vm103_vm0, %v1624_v26, 0.0 }
 0x38c   :  { %1684 = vadd.xlane.f32.xlu0 %v1683_v29  ;;  %1690 = vadd.xlane.f32.xlu1 %v1689_v23  ;;  %v2644_v29 = vld [vmem:[%s3765_s1 + $0xd0] sm:$0xff]  ;;  %v1653_v23 = vsel %vm103_vm0, %v1589_v1, 0.0  ;;  %v3553_v1 = vand.u32 127, %v1821_v57 }
 0x38d   :  { %v1607_v19 = vmul.f32 %v2644_v29, %v1575_v16  ;;  %v1610_v17 = vmul.f32 %v2651_v59, %v1578_v30 }
 0x38e   :  { %v1834_v28 = vadd.s32 4294967280, %v3553_v1 }
 0x38f   :  { %v1707_v31 = vsel %vm103_vm0, %v1607_v19, 0.0  ;;  %v1716_v22 = vsel %vm103_vm0, %v1610_v17, 0.0 }
 0x390   :  { %1693 = vadd.xlane.f32.xlu0 %v1692_v9  ;;  %1738 = vadd.xlane.f32.xlu1 %v1737_v35  ;;  %v1623_v9 = vmul.f32 %v2646_v63, %v1575_v16  ;;  %v1542_v35 = vpop.permute.xlu0 %1541 }
 0x391   :  { %v1577_v15 = vmul.f32 %v3343_v60, %v1542_v35 }
 0x392   :  { %v1755_v55 = vsel %vm103_vm0, %v1623_v9, 0.0 }
 0x393   :  { %v1625_v47 = vmul.f32 %v2652_v56, %v1577_v15 }
 0x394   :  { %1741 = vadd.xlane.f32.xlu0 %v1740_v48  ;;  %1651 = vadd.xlane.f32.xlu1 %v1650_v41  ;;  %v1594_v48 = vmul.f32 %v2648_v38, %v1578_v30  ;;  %v2649_v41 = vld [vmem:[%s3765_s1 + $0x50] sm:$0xff]  ;;  %v1552_v61 = vpop.permute.xlu0 %1551 }
 0x395   :  { %v1591_v42 = vmul.f32 %v2649_v41, %v1575_v16  ;;  %v1579_v39 = vmul.f32 %v3343_v60, %v1552_v61  ;;  %v1761_v43 = vsel %vm103_vm0, %v1625_v47, 0.0  ;;  %v1841_v41 = vadd.s32 4294967272, %v3553_v1 }
 0x396   :  { %v1668_v45 = vsel %vm103_vm0, %v1594_v48, 0.0 }
 0x397   :  { %v1659_v24 = vsel %vm103_vm0, %v1591_v42, 0.0  ;;  %v1627_v52 = vmul.f32 %v2658_v11, %v1579_v39  ;;  %v1595_v16 = vmul.f32 %v2659_v7, %v1579_v39 }
 0x398   :  { %1642 = vadd.xlane.f32.xlu0 %v1641_v46  ;;  %1696 = vadd.xlane.f32.xlu1 %v1695_v25  ;;  %v2650_v46 = vld [vmem:[%s3765_s1 + $0xe0] sm:$0xff]  ;;  %v1557_v25 = vpop.permute.xlu1 %1556 }
 0x399   :  { %v1609_v5 = vmul.f32 %v2650_v46, %v1577_v15  ;;  %v1580_v49 = vmul.f32 %v3343_v60, %v1557_v25  ;;  %v1593_v60 = vmul.f32 %v2655_v54, %v1577_v15  ;;  %v1767_v6 = vsel %vm103_vm0, %v1627_v52, 0.0 }
 0x39b   :  { %v1713_v50 = vsel %vm103_vm0, %v1609_v5, 0.0  ;;  %v1665_v51 = vsel %vm103_vm0, %v1593_v60, 0.0  ;;  %v1612_v13 = vmul.f32 %v2657_v12, %v1580_v49 }
 0x39c   :  { %1699 = vadd.xlane.f32.xlu0 %v1698_v34  ;;  %1744 = vadd.xlane.f32.xlu1 %v1743_v21  ;;  %v2653_v34 = vld [vmem:[%s3765_s1 + $0x168] sm:$0xff] }
 0x39d   :  { %v1626_v21 = vmul.f32 %v2653_v34, %v1578_v30  ;;  %v1722_v4 = vsel %vm103_vm0, %v1612_v13, 0.0 }
 0x3a0   :  { %1747 = vadd.xlane.f32.xlu0 %v1746_v62  ;;  %1657 = vadd.xlane.f32.xlu1 %v1656_v0  ;;  %v1596_v62 = vmul.f32 %v2654_v37, %v1580_v49  ;;  %v1764_v0 = vsel %vm103_vm0, %v1626_v21, 0.0 }
 0x3a2   :  { %v1674_v3 = vsel %vm103_vm0, %v1596_v62, 0.0 }
 0x3a4   :  { %1648 = vadd.xlane.f32.xlu0 %v1647_v2  ;;  %1702 = vadd.xlane.f32.xlu1 %v1701_v40  ;;  %v1611_v2 = vmul.f32 %v2656_v10, %v1579_v39 }
 0x3a6   :  { %v1719_v40 = vsel %vm103_vm0, %v1611_v2, 0.0 }
 0x3a8   :  { %1705 = vadd.xlane.f32.xlu0 %v1704_v14  ;;  %1750 = vadd.xlane.f32.xlu1 %v1749_v53  ;;  %v1671_v14 = vsel %vm103_vm0, %v1595_v16, 0.0  ;;  %v2660_v53 = vld [vmem:[%s3765_s1 + $0x178] sm:$0xff]  ;;  %s2684_s1 = smov [#allocation3]  }
 0x3a9   :  { %v1628_v27 = vmul.f32 %v2660_v53, %v1580_v49  ;;  %s2102_s14 = sshll.u32 %s2684_s1, 4  ;;  %s2103_s14 = int_to_ptr.vmem [resolvable:$true] %s2102_s14 }
 0x3aa   :  { %s2661_s4 = scalar_lea.vmem %s2103_s14, 64  ;;  %p2666_p1 = scmp.lt.s32.totalorder %s2103_s14, %s2103_s14 }
 0x3ab   :  { %v1770_v8 = vsel %vm103_vm0, %v1628_v27, 0.0  ;;  %vm1839_vm0 = vcmask 195712   ;;  %p2662_p0 = scmp.ne.s32.totalorder %s2103_s14, %s2661_s4  ;;  %p2667_p2 = scmp.lt.s32.totalorder %s2661_s4, %s2661_s4 }
 0x3ac   :  { %1753 = vadd.xlane.f32.xlu0 %v1752_v18  ;;  %1663 = vadd.xlane.f32.xlu1 %v1662_v58  ;;  %v3555_v18 = vshrl.u32 %v1821_v57, 7  ;;  %v1827_v58 = vadd.s32 4294967288, %v3553_v1 }
 0x3ad   :  { %p2668_p3 = por %p2667_p2, %p2666_p1 }
 0x3ae   :  { %v1830_v20 = vsub.s32 %v1827_v58, %v3555_v18  ;;  %v1844_v46 = vsub.s32 %v1841_v41, %v3555_v18  ;;  %v1848_v58 = vadd.s32 4294967264, %v3553_v1 }
 0x3af   :  { %p2669_p4 = pnand %p2668_p3, %p2662_p0 }
 0x3b0   :  { %1654 = vadd.xlane.f32.xlu0 %v1653_v23  ;;  %1708 = vadd.xlane.f32.xlu1 %v1707_v31  ;;  %v1825_v23 = vsub.s32 %v3553_v1, %v3555_v18 }
 0x3b4   :  { %1711 = vadd.xlane.f32.xlu0 %v1710_v36  ;;  %1756 = vadd.xlane.f32.xlu1 %v1755_v55 }
 0x3b8   :  { %1759 = vadd.xlane.f32.xlu0 %v1758_v44  ;;  %1669 = vadd.xlane.f32.xlu1 %v1668_v45  ;;  %v1837_v45 = vsub.s32 %v1834_v28, %v3555_v18 }
 0x3bc   :  { %1660 = vadd.xlane.f32.xlu0 %v1659_v24  ;;  %1714 = vadd.xlane.f32.xlu1 %v1713_v50 }
 0x3c0   :  { %1717 = vadd.xlane.f32.xlu0 %v1716_v22  ;;  %1762 = vadd.xlane.f32.xlu1 %v1761_v43 }
 0x3c4   :  { %1765 = vadd.xlane.f32.xlu0 %v1764_v0  ;;  %1675 = vadd.xlane.f32.xlu1 %v1674_v3 }
 0x3c8   :  { %1666 = vadd.xlane.f32.xlu0 %v1665_v51  ;;  %1720 = vadd.xlane.f32.xlu1 %v1719_v40 }
 0x3cc   :  { %1723 = vadd.xlane.f32.xlu0 %v1722_v4  ;;  %1768 = vadd.xlane.f32.xlu1 %v1767_v6 }
 0x3d0   :  { %1672 = vadd.xlane.f32.xlu0 %v1671_v14 }
 0x3d4   :  { %1771 = vadd.xlane.f32.xlu0 %v1770_v8 }
 0x3fd   :  { %v1634_v29 = vpop.xlane.xlu1 %1633  ;;  %v1730_v19 = vpop.xlane.xlu0 %1729 }
 0x3fe   :  { %v1831_v32 = vrot.slane %v1634_v29, %v1830_v20  ;;  %v2018_v26 = vrot.slane %v1730_v19, %v1830_v20  ;;  %v1855_v29 = vadd.s32 4294967256, %v3553_v1 }
 0x401   :  { %v1682_v30 = vpop.xlane.xlu1 %1681  ;;  %v1631_v31 = vpop.xlane.xlu0 %1630 }
 0x402   :  { %v1826_v33 = vrot.slane %v1631_v31, %v1825_v23  ;;  %v1939_v15 = vrot.slane %v1682_v30, %v1830_v20  ;;  %v1862_v30 = vadd.s32 4294967248, %v3553_v1  ;;  %v1869_v31 = vadd.s32 4294967240, %v3553_v1 }
 0x404   :  { %v1833_v63 = vsel %vm1832_vm3, %v1831_v32, %v1826_v33  ;;  %v1858_v33 = vsub.s32 %v1855_v29, %v3555_v18  ;;  %v3626_v28 = vsub.s32 %v1862_v30, %v3555_v18 }
 0x405   :  { %v1727_v9 = vpop.xlane.xlu1 %1726  ;;  %v1679_v35 = vpop.xlane.xlu0 %1678 }
 0x406   :  { %v2014_v36 = vrot.slane %v1727_v9, %v1825_v23  ;;  %v1935_v55 = vrot.slane %v1679_v35, %v1825_v23  ;;  %v1851_v23 = vsub.s32 %v1848_v58, %v3555_v18 }
 0x408   :  { %v2019_v38 = vsel %vm1832_vm3, %v2018_v26, %v2014_v36  ;;  %v1940_v48 = vsel %vm1832_vm3, %v1939_v15, %v1935_v55  ;;  %v1876_v26 = vadd.s32 4294967232, %v3553_v1  ;;  %v1897_v15 = vadd.s32 4294967208, %v3553_v1 }
 0x409   :  { %v1640_v42 = vpop.xlane.xlu1 %1639  ;;  %v1688_v44 = vpop.xlane.xlu0 %1687  ;;  %v3631_v36 = vsub.s32 %v1869_v31, %v3555_v18  ;;  %vm2092_vm3 = vcmask 1042434  }
 0x40a   :  { %v1845_v61 = vrot.slane %v1640_v42, %v1844_v46  ;;  %v1949_v37 = vrot.slane %v1688_v44, %v1844_v46  ;;  %v1890_v42 = vadd.s32 4294967216, %v3553_v1 }
 0x40d   :  { %v1733_v5 = vpop.xlane.xlu1 %1732  ;;  %v1736_v25 = vpop.xlane.xlu0 %1735 }
 0x40e   :  { %v2023_v24 = vrot.slane %v1733_v5, %v1837_v45  ;;  %v2028_v49 = vrot.slane %v1736_v25, %v1844_v46  ;;  %v1879_v46 = vsub.s32 %v1876_v26, %v3555_v18  ;;  %v1911_v5 = vadd.s32 4294967192, %v3553_v1 }
 0x40f   :  { %v1904_v25 = vadd.s32 4294967200, %v3553_v1 }
 0x410   :  { %v2024_v50 = vsel %vm1839_vm0, %v2023_v24, %v2019_v38 }
 0x411   :  { %v3566_v59 = vsel %vm1846_vm4, %v2028_v49, %v2024_v50  ;;  %v3568_v17 = vpop.xlane.xlu1 %1645  ;;  %v1637_v56 = vpop.xlane.xlu0 %1636  ;;  %v3649_v49 = vsub.s32 %v1897_v15, %v3555_v18  ;;  %v1925_v50 = vadd.s32 4294967176, %v3553_v1 }
 0x412   :  { %v1838_v47 = vrot.slane %v1637_v56, %v1837_v45 }
 0x414   :  { %v1840_v34 = vsel %vm1839_vm0, %v1838_v47, %v1833_v63  ;;  %v1883_v63 = vadd.s32 4294967224, %v3553_v1  ;;  %v1918_v47 = vadd.s32 4294967184, %v3553_v1  ;;  %v3668_v1 = vsub.s32 %v1911_v5, %v3555_v18 }
 0x415   :  { %v3571_v21 = vpop.xlane.xlu1 %1690  ;;  %v1685_v39 = vpop.xlane.xlu0 %1684  ;;  %v1847_v22 = vsel %vm1846_vm4, %v1845_v61, %v1840_v34 }
 0x416   :  { %v1944_v43 = vrot.slane %v1685_v39, %v1837_v45  ;;  %v3637_v41 = vsub.s32 %v1883_v63, %v3555_v18  ;;  %v1954_v61 = vrot.slane %v3571_v21, %v1851_v23  ;;  %v3671_v21 = vsub.s32 %v1904_v25, %v3555_v18 }
 0x418   :  { %v1945_v62 = vsel %vm1839_vm0, %v1944_v43, %v1940_v48  ;;  %v1859_v48 = vrot.slane %v3568_v17, %v1858_v33 }
 0x419   :  { %v3574_v0 = vsel %vm1846_vm4, %v1949_v37, %v1945_v62  ;;  %v3576_v3 = vpop.xlane.xlu1 %1738  ;;  %v3578_v54 = vpop.xlane.xlu0 %1693 }
 0x41a   :  { %v2033_v34 = vrot.slane %v3576_v3, %v1851_v23  ;;  %v1959_v62 = vrot.slane %v3578_v54, %v1858_v33  ;;  %v1955_v3 = vsel %vm1853_vm5, %v1954_v61, %v3574_v0  ;;  %v3679_v54 = vsub.s32 %v1925_v50, %v3555_v18 }
 0x41b   :  { %v3687_v0 = vsub.s32 %v1918_v47, %v3555_v18 }
 0x41c   :  { %v1960_v31 = vsel %vm1860_vm6, %v1959_v62, %v1955_v3 }
 0x41d   :  { %v3580_v60 = vpop.xlane.xlu1 %1651  ;;  %v3582_v10 = vpop.xlane.xlu0 %1741 }
 0x41e   :  { %v1873_v39 = vrot.slane %v3580_v60, %v3631_v36 }
 0x421   :  { %v3584_v2 = vpop.xlane.xlu1 %1696  ;;  %v1643_v51 = vpop.xlane.xlu0 %1642 }
 0x422   :  { %v1852_v32 = vrot.slane %v1643_v51, %v1851_v23  ;;  %v2038_v51 = vrot.slane %v3582_v10, %v1858_v33  ;;  %v1964_v60 = vrot.slane %v3584_v2, %v3626_v28  ;;  %v2034_v2 = vsel %vm1853_vm5, %v2033_v34, %v3566_v59 }
 0x424   :  { %v1854_v55 = vsel %vm1853_vm5, %v1852_v32, %v1847_v22  ;;  %v3659_v22 = vsub.s32 %v1890_v42, %v3555_v18  ;;  %v2039_v32 = vsel %vm1860_vm6, %v2038_v51, %v2034_v2 }
 0x425   :  { %v3586_v40 = vpop.xlane.xlu1 %1744  ;;  %v3588_v12 = vpop.xlane.xlu0 %1699  ;;  %v1861_v24 = vsel %vm1860_vm6, %v1859_v48, %v1854_v55 }
 0x426   :  { %v2043_v10 = vrot.slane %v3586_v40, %v3626_v28  ;;  %v1969_v29 = vrot.slane %v3588_v12, %v3631_v36  ;;  %v1965_v12 = vsel %vm1867_vm7, %v1964_v60, %v1960_v31 }
 0x428   :  { %v1970_v26 = vsel %vm1874_vm8, %v1969_v29, %v1965_v12 }
 0x429   :  { %v3590_v13 = vpop.xlane.xlu1 %1657  ;;  %v3592_v11 = vpop.xlane.xlu0 %1747 }
 0x42a   :  { %v1887_v23 = vrot.slane %v3590_v13, %v3637_v41  ;;  %v2048_v40 = vrot.slane %v3592_v11, %v3631_v36 }
 0x42d   :  { %v3594_v52 = vpop.xlane.xlu1 %1702  ;;  %v1649_v4 = vpop.xlane.xlu0 %1648 }
 0x42e   :  { %v1866_v38 = vrot.slane %v1649_v4, %v3626_v28  ;;  %v1974_v18 = vrot.slane %v3594_v52, %v1879_v46 }
 0x430   :  { %v1868_v17 = vsel %vm1867_vm7, %v1866_v38, %v1861_v24  ;;  %v1975_v55 = vsel %vm1881_vm9, %v1974_v18, %v1970_v26 }
 0x431   :  { %v3596_v6 = vpop.xlane.xlu1 %1750  ;;  %v3598_v7 = vpop.xlane.xlu0 %1705  ;;  %v1875_v4 = vsel %vm1874_vm8, %v1873_v39, %v1868_v17 }
 0x432   :  { %v2053_v33 = vrot.slane %v3596_v6, %v1879_v46  ;;  %v1979_v13 = vrot.slane %v3598_v7, %v3637_v41 }
 0x435   :  { %v3600_v16 = vpop.xlane.xlu1 %1663  ;;  %v3602_v14 = vpop.xlane.xlu0 %1753 }
 0x436   :  { %v2058_v11 = vrot.slane %v3602_v14, %v3637_v41  ;;  %v1901_v7 = vrot.slane %v3600_v16, %v3649_v49  ;;  %v1980_v41 = vsel %vm1888_vm10, %v1979_v13, %v1975_v55 }
 0x439   :  { %v3604_v53 = vpop.xlane.xlu1 %1708  ;;  %v1655_v27 = vpop.xlane.xlu0 %1654 }
 0x43a   :  { %v1880_v56 = vrot.slane %v1655_v27, %v1879_v46  ;;  %v1984_v52 = vrot.slane %v3604_v53, %v3659_v22 }
 0x43c   :  { %v1882_v27 = vsel %vm1881_vm9, %v1880_v56, %v1875_v4  ;;  %v1985_v46 = vsel %vm1895_vm11, %v1984_v52, %v1980_v41 }
 0x43d   :  { %v3606_v8 = vpop.xlane.xlu1 %1756  ;;  %v3608_v57 = vpop.xlane.xlu0 %1711  ;;  %v1889_v63 = vsel %vm1888_vm10, %v1887_v23, %v1882_v27 }
 0x43e   :  { %v1989_v14 = vrot.slane %v3608_v57, %v3649_v49  ;;  %v2063_v53 = vrot.slane %v3606_v8, %v3659_v22 }
 0x441   :  { %v3612_v19 = vpop.xlane.xlu1 %1669  ;;  %v3614_v20 = vpop.xlane.xlu0 %1759 }
 0x442   :  { %v2068_v5 = vrot.slane %v3614_v20, %v3649_v49  ;;  %v1915_v50 = vrot.slane %v3612_v19, %v3668_v1 }
 0x445   :  { %v3621_v9 = vpop.xlane.xlu1 %1714  ;;  %v3623_v35 = vpop.xlane.xlu0 %1660 }
 0x446   :  { %v1894_v58 = vrot.slane %v3623_v35, %v3659_v22  ;;  %v2044_v35 = vsel %vm1867_vm7, %v2043_v10, %v2039_v32  ;;  %v1994_v48 = vrot.slane %v3621_v9, %v3671_v21  ;;  %v1990_v9 = vsel %vm1902_vm12, %v1989_v14, %v1985_v46 }
 0x447   :  { %v2049_v15 = vsel %vm1874_vm8, %v2048_v40, %v2044_v35 }
 0x448   :  { %v1896_v6 = vsel %vm1895_vm11, %v1894_v58, %v1889_v63  ;;  %v2054_v38 = vsel %vm1881_vm9, %v2053_v33, %v2049_v15  ;;  %v1995_v20 = vsel %vm1909_vm13, %v1994_v48, %v1990_v9 }
 0x449   :  { %v3640_v44 = vpop.xlane.xlu1 %1762  ;;  %v3642_v45 = vpop.xlane.xlu0 %1717  ;;  %v2059_v42 = vsel %vm1888_vm10, %v2058_v11, %v2054_v38  ;;  %v1903_v57 = vsel %vm1902_vm12, %v1901_v7, %v1896_v6 }
 0x44a   :  { %v1999_v16 = vrot.slane %v3642_v45, %v3668_v1  ;;  %v2073_v45 = vrot.slane %v3640_v44, %v3671_v21  ;;  %v2064_v47 = vsel %vm1895_vm11, %v2063_v53, %v2059_v42 }
 0x44b   :  { %v2069_v22 = vsel %vm1902_vm12, %v2068_v5, %v2064_v47 }
 0x44c   :  { %v2000_v34 = vsel %vm1916_vm14, %v1999_v16, %v1995_v20 }
 0x44d   :  { %v3661_v43 = vpop.xlane.xlu1 %1675  ;;  %v3663_v37 = vpop.xlane.xlu0 %1765 }
 0x44e   :  { %v2078_v49 = vrot.slane %v3663_v37, %v3668_v1  ;;  %v1929_v19 = vrot.slane %v3661_v43, %v3679_v54 }
 0x451   :  { %v1667_v30 = vpop.xlane.xlu0 %1666  ;;  %v1721_v59 = vpop.xlane.xlu1 %1720 }
 0x452   :  { %v1908_v28 = vrot.slane %v1667_v30, %v3671_v21  ;;  %v2004_v25 = vrot.slane %v1721_v59, %v3687_v0  ;;  %v2074_v21 = vsel %vm1909_vm13, %v2073_v45, %v2069_v22 }
 0x453   :  { %v2079_v43 = vsel %vm1916_vm14, %v2078_v49, %v2074_v21 }
 0x454   :  { %v1910_v8 = vsel %vm1909_vm13, %v1908_v28, %v1903_v57  ;;  %v2005_v62 = vsel %vm1923_vm15, %v2004_v25, %v2000_v34 }
 0x455   :  { %v1724_v36 = vpop.xlane.xlu0 %1723  ;;  %v1769_v24 = vpop.xlane.xlu1 %1768  ;;  %v1917_v44 = vsel %vm1916_vm14, %v1915_v50, %v1910_v8 }
 0x456   :  { %v2009_v17 = vrot.slane %v1724_v36, %v3679_v54  ;;  %v2083_v39 = vrot.slane %v1769_v24, %v3687_v0 }
 0x458   :  { %v2010_v37 = vsel %vm1930_vm1, %v2009_v17, %v2005_v62  ;;  %v2084_v10 = vsel %vm1923_vm15, %v2083_v39, %v2079_v43 }
 0x459   :  { %v1673_v56 = vpop.xlane.xlu0 %1672 }
 0x45a   :  { %v1922_v61 = vrot.slane %v1673_v56, %v3687_v0 }
 0x45c   :  { %v1924_v51 = vsel %vm1923_vm15, %v1922_v61, %v1917_v44 }
 0x45d   :  { %v1772_v1 = vpop.xlane.xlu0 %1771  ;;  %v1931_v3 = vsel %vm1930_vm1, %v1929_v19, %v1924_v51 }
 0x45e   :  { %v2088_v60 = vrot.slane %v1772_v1, %v3679_v54  ;;  %v2091_v4 = vsel %vm2090_vm2, %v2010_v37, %v1931_v3 }
 0x460   :  { %v2089_v27 = vsel %vm1930_vm1, %v2088_v60, %v2084_v10 }
 0x461   :  { %v2093_v58 = vsel %vm2092_vm3, %v2089_v27, %v2091_v4 }
 0x462   :  { %2095 = vst [vmem:[#allocation3] sm:$0x7] %v2093_v58 }
 0x463   :  { %2672 = shalt.err (!%p2669_p4)
}
 0x464   :  { %2105 = dma.vmem_to_hbm [thread:$0]  %s2103_s14, 64, %s3773_s9, [#allocation4]  }
 0x465   :  { %2681 = dma.done.wait [#allocation4], 64  }
 0x466   :  { %2682 = vsyncadd [#allocation4], 4294967232 }
 0x467   :  { %2109 = vsyncpa [#allocation4], 1 }

</bundles_post_ra>
